<compile_context>
chip_gen: v7x
topology: tpu7x:2x2x1
jax: 0.10.0
libtpu: 0.0.40
codegen_flags: <defaults>
</compile_context>

<pallas_src>
import jax
import jax.numpy as jnp
from jax.experimental import pallas as pl
from jax.experimental.pallas import tpu as pltpu

_VMEM = pl.BlockSpec(memory_space=pltpu.MemorySpace.VMEM)


# ---------------------------------------------------------------------------
# In-kernel 2x2 / stride-2 max pool of a (R, W) f32 value.
# ---------------------------------------------------------------------------
def _maxpool2x2_value(x):
    R, W = x.shape
    Rh, Wh = R // 2, W // 2
    f32 = jnp.float32

    # Column (lane-pair) compaction selectors: E[w, c] = (w == 2c + off), shape (W, Wh).
    w_i = jax.lax.broadcasted_iota(jnp.int32, (W, Wh), 0)
    c_i = jax.lax.broadcasted_iota(jnp.int32, (W, Wh), 1)
    e_even = (w_i == 2 * c_i).astype(f32)
    e_odd = (w_i == 2 * c_i + 1).astype(f32)
    # Multiplying by exact 0/1 and summing a single nonzero term is exact in f32.
    colmax = jnp.maximum(
        jnp.dot(x, e_even, preferred_element_type=f32),
        jnp.dot(x, e_odd, preferred_element_type=f32),
    )                                                               # (R, Wh)

    # Row (sublane-pair) compaction selectors: S[k, r] = (r == 2k + off), shape (Rh, R).
    k_i = jax.lax.broadcasted_iota(jnp.int32, (Rh, R), 0)
    r_i = jax.lax.broadcasted_iota(jnp.int32, (Rh, R), 1)
    s_even = (r_i == 2 * k_i).astype(f32)
    s_odd = (r_i == 2 * k_i + 1).astype(f32)
    return jnp.maximum(
        jnp.dot(s_even, colmax, preferred_element_type=f32),
        jnp.dot(s_odd, colmax, preferred_element_type=f32),
    )                                                               # (Rh, Wh)


# ---------------------------------------------------------------------------
# Fused kernel: pyramid + masks + error maps + weighted loss, one pallas_call.
# ---------------------------------------------------------------------------
def _make_fused_kernel(nscales):
    def kernel(*refs):
        # inputs:  gt0, est_0 .. est_{n-1}
        # outputs: gt_1 .. gt_{n-1}, err_0 .. err_{n-1}, loss (1,1)
        gt0_ref = refs[0]
        est_refs = refs[1:1 + nscales]
        off = 1 + nscales
        gt_out_refs = refs[off:off + nscales - 1]
        off += nscales - 1
        err_refs = refs[off:off + nscales]
        loss_ref = refs[off + nscales]

        gt = gt0_ref[...]
        loss = jnp.float32(0.0)
        for i in range(nscales):
            est = est_refs[i][...]
            mask = (gt > 0.0).astype(jnp.float32)                   # left_valid_mask
            err = jnp.abs(est - gt) * mask                          # left_disp_error
            err_refs[i][...] = err
            # masked mean of |est/20 - gt/20| == 0.05 * sum(err) / sum(mask)
            cnt = jnp.sum(mask)
            weight = jnp.float32(0.05 / (2.0 ** i))
            loss = loss + jnp.sum(err) * weight / cnt
            if i + 1 < nscales:
                gt = _maxpool2x2_value(gt)                          # next pyramid level
                gt_out_refs[i][...] = gt
        loss_ref[...] = jnp.reshape(loss, (1, 1))

    return kernel


# ---------------------------------------------------------------------------
# Forward pass (matches StereoSupervisedWithoutOccmaskLoss.forward).
# ---------------------------------------------------------------------------
def stereo_supervised_without_occmask_loss(disp_ests, left_gt):
    nscales = len(disp_ests)
    assert left_gt is not None
    b, c, h, w = left_gt.shape

    # Flatten NCHW -> 2-D slabs (rows = N*C*H on sublanes, W on lanes). Cheap views.
    gt0_2d = left_gt.reshape(b * c * h, w)
    est_2d = [disp_ests[i].reshape(b * c * (h >> i), w >> i) for i in range(nscales)]

    out_shape = (
        tuple(jax.ShapeDtypeStruct((b * c * (h >> i), w >> i), jnp.float32)
              for i in range(1, nscales))                    # gt pyramid levels 1..n-1
        + tuple(jax.ShapeDtypeStruct((b * c * (h >> i), w >> i), jnp.float32)
                for i in range(nscales))                     # error maps 0..n-1
        + (jax.ShapeDtypeStruct((1, 1), jnp.float32),)       # weighted l1 loss
    )
    out_specs = (_VMEM,) * (nscales - 1) + (_VMEM,) * nscales + (_VMEM,)
    in_specs = [_VMEM] * (1 + nscales)

    outs = pl.pallas_call(
        _make_fused_kernel(nscales),
        out_shape=out_shape,
        in_specs=in_specs,
        out_specs=out_specs,
    )(gt0_2d, *est_2d)

    gt_outs = outs[:nscales - 1]
    err_outs = outs[nscales - 1:2 * nscales - 1]
    total_loss = outs[-1][0, 0]

    left_gts = [left_gt] + [
        gt_outs[i - 1].reshape(b, c, h >> i, w >> i) for i in range(1, nscales)
    ]
    disp_errors = [err_outs[i].reshape(b, c, h >> i, w >> i) for i in range(nscales)]

    scalar_outputs = {"total_loss": total_loss, "l1_loss": total_loss}
    image_outputs = {
        "left_disp_est": disp_ests,
        "left_disp_error": disp_errors,
        "left_disp_gt": left_gts,
    }
    return total_loss, scalar_outputs, image_outputs


# ---------------------------------------------------------------------------
# Pure-JAX reference (correctness sanity check, exact PyTorch formulas).
# ---------------------------------------------------------------------------
def _ref_forward(disp_ests, left_gt):
    gts = [left_gt]
    for _ in range(len(disp_ests) - 1):
        g = gts[-1]
        b, c, h, w = g.shape
        gts.append(jnp.max(g.reshape(b, c, h // 2, 2, w // 2, 2), axis=(3, 5)))
    loss = jnp.float32(0.0)
    errs = []
    for i in range(len(disp_ests)):
        mask = (gts[i] > 0.0).astype(jnp.float32)
        diff = jnp.abs(disp_ests[i] / 20.0 - gts[i] / 20.0)
        loss = loss + (jnp.sum(diff * mask) / jnp.sum(mask)) / (2 ** i)
        errs.append(jnp.abs(disp_ests[i] - gts[i]) * mask)
    return loss, gts, errs


if __name__ == "__main__":
    key = jax.random.PRNGKey(0)
    B, C, H, W = 2, 1, 32, 32
    nscales = 4

    k_gt, k_est = jax.random.split(key)
    raw = jax.random.uniform(k_gt, (B, C, H, W), jnp.float32)
    # GT disparity with some invalid (==0) pixels to exercise the valid mask.
    left_gt = jnp.where(raw > 0.3, raw * 50.0, 0.0)

    est_keys = jax.random.split(k_est, nscales)
    disp_ests = [
        jax.random.uniform(est_keys[i], (B, C, H >> i, W >> i), jnp.float32) * 50.0
        for i in range(nscales)
    ]

    fwd = jax.jit(stereo_supervised_without_occmask_loss)
    total_loss, scalars, images = fwd(disp_ests, left_gt)
    jax.block_until_ready((total_loss, scalars, images))

    # Sanity check against a pure-JAX reference.
    ref_loss, ref_gts, ref_errs = _ref_forward(disp_ests, left_gt)
    assert jnp.allclose(total_loss, ref_loss, rtol=1e-4, atol=1e-5)
    assert jnp.allclose(scalars["l1_loss"], ref_loss, rtol=1e-4, atol=1e-5)
    for i in range(nscales):
        assert jnp.allclose(images["left_disp_gt"][i], ref_gts[i], rtol=1e-5, atol=1e-5)
        assert jnp.allclose(images["left_disp_error"][i], ref_errs[i], rtol=1e-5, atol=1e-5)

    print("KERNEL_OK")
</pallas_src>

<mosaic_0001>
module attributes {stable_mosaic.version = 11 : i64} {
  func.func @kernel(%arg0: memref<64x32xf32, #tpu.memory_space<vmem>>, %arg1: memref<64x32xf32, #tpu.memory_space<vmem>>, %arg2: memref<32x16xf32, #tpu.memory_space<vmem>>, %arg3: memref<16x8xf32, #tpu.memory_space<vmem>>, %arg4: memref<8x4xf32, #tpu.memory_space<vmem>>, %arg5: memref<32x16xf32, #tpu.memory_space<vmem>>, %arg6: memref<16x8xf32, #tpu.memory_space<vmem>>, %arg7: memref<8x4xf32, #tpu.memory_space<vmem>>, %arg8: memref<64x32xf32, #tpu.memory_space<vmem>>, %arg9: memref<32x16xf32, #tpu.memory_space<vmem>>, %arg10: memref<16x8xf32, #tpu.memory_space<vmem>>, %arg11: memref<8x4xf32, #tpu.memory_space<vmem>>, %arg12: memref<1x1xf32, #tpu.memory_space<vmem>>) attributes {dimension_semantics = [], scalar_prefetch = 0 : i64, scratch_operands = 0 : i64, tpu.core_type = #tpu.core_type<tc>} {
    %c0 = arith.constant 0 : index
    %c0_0 = arith.constant 0 : index
    %0 = vector.load %arg0[%c0, %c0_0] : memref<64x32xf32, #tpu.memory_space<vmem>>, vector<64x32xf32>
    %c0_1 = arith.constant 0 : index
    %c0_2 = arith.constant 0 : index
    %1 = vector.load %arg1[%c0_1, %c0_2] : memref<64x32xf32, #tpu.memory_space<vmem>>, vector<64x32xf32>
    %cst = arith.constant 0.000000e+00 : f32
    %2 = vector.broadcast %cst : f32 to vector<64x32xf32>
    %3 = arith.cmpf ogt, %0, %2 : vector<64x32xf32>
    %4 = arith.extui %3 : vector<64x32xi1> to vector<64x32xi32>
    %5 = arith.sitofp %4 : vector<64x32xi32> to vector<64x32xf32>
    %6 = arith.subf %1, %0 : vector<64x32xf32>
    %7 = math.absf %6 : vector<64x32xf32>
    %8 = arith.mulf %7, %5 : vector<64x32xf32>
    %c0_3 = arith.constant 0 : index
    %c0_4 = arith.constant 0 : index
    %9 = vector.load %arg8[%c0_3, %c0_4] : memref<64x32xf32, #tpu.memory_space<vmem>>, vector<64x32xf32>
    tpu.vector_store %arg8[%c0_3, %c0_4], %8 {strides = array<i32>} : memref<64x32xf32, #tpu.memory_space<vmem>>, vector<64x32xf32>,
    %10 = vector.shape_cast %5 : vector<64x32xf32> to vector<1x64x32xf32>
    %cst_5 = arith.constant dense<0.000000e+00> : vector<1xf32>
    %11 = vector.multi_reduction <add>, %10, %cst_5 [1, 2] : vector<1x64x32xf32> to vector<1xf32>
    %12 = vector.shape_cast %11 : vector<1xf32> to vector<1x1x1xf32>
    %13 = vector.extract %12[0, 0, 0] : f32 from vector<1x1x1xf32>
    %14 = vector.shape_cast %8 : vector<64x32xf32> to vector<1x64x32xf32>
    %cst_6 = arith.constant dense<0.000000e+00> : vector<1xf32>
    %15 = vector.multi_reduction <add>, %14, %cst_6 [1, 2] : vector<1x64x32xf32> to vector<1xf32>
    %16 = vector.shape_cast %15 : vector<1xf32> to vector<1x1x1xf32>
    %17 = vector.extract %16[0, 0, 0] : f32 from vector<1x1x1xf32>
    %cst_7 = arith.constant 5.000000e-02 : f32
    %18 = arith.mulf %17, %cst_7 : f32
    %19 = arith.divf %18, %13 : f32
    %cst_8 = arith.constant 0.000000e+00 : f32
    %20 = arith.addf %cst_8, %19 : f32
    %21 = tpu.iota {dimensions = array<i32: 0>} : vector<32x16xi32>
    %22 = tpu.iota {dimensions = array<i32: 1>} : vector<32x16xi32>
    %c2_i32 = arith.constant 2 : i32
    %23 = vector.broadcast %c2_i32 : i32 to vector<32x16xi32>
    %24 = arith.muli %23, %22 : vector<32x16xi32>
    %25 = arith.cmpi eq, %21, %24 : vector<32x16xi32>
    %26 = arith.extui %25 : vector<32x16xi1> to vector<32x16xi32>
    %27 = arith.sitofp %26 : vector<32x16xi32> to vector<32x16xf32>
    %c2_i32_9 = arith.constant 2 : i32
    %28 = vector.broadcast %c2_i32_9 : i32 to vector<32x16xi32>
    %29 = arith.muli %28, %22 : vector<32x16xi32>
    %c1_i32 = arith.constant 1 : i32
    %30 = vector.broadcast %c1_i32 : i32 to vector<32x16xi32>
    %31 = arith.addi %29, %30 : vector<32x16xi32>
    %32 = arith.cmpi eq, %21, %31 : vector<32x16xi32>
    %33 = arith.extui %32 : vector<32x16xi1> to vector<32x16xi32>
    %34 = arith.sitofp %33 : vector<32x16xi32> to vector<32x16xf32>
    %cst_10 = arith.constant dense<0.000000e+00> : vector<64x16xf32>
    %35 = tpu.matmul %0, %27, %cst_10 {dimension_numbers = #tpu.dot_dimension_numbers<[1], [0], [0], [1], [0, 0, 1, 1], [], []>} : vector<64x32xf32>, vector<32x16xf32>, vector<64x16xf32> -> vector<64x16xf32>
    %cst_11 = arith.constant dense<0.000000e+00> : vector<64x16xf32>
    %36 = tpu.matmul %0, %34, %cst_11 {dimension_numbers = #tpu.dot_dimension_numbers<[1], [0], [0], [1], [0, 0, 1, 1], [], []>} : vector<64x32xf32>, vector<32x16xf32>, vector<64x16xf32> -> vector<64x16xf32>
    %37 = arith.maximumf %35, %36 : vector<64x16xf32>
    %38 = tpu.iota {dimensions = array<i32: 0>} : vector<32x64xi32>
    %39 = tpu.iota {dimensions = array<i32: 1>} : vector<32x64xi32>
    %c2_i32_12 = arith.constant 2 : i32
    %40 = vector.broadcast %c2_i32_12 : i32 to vector<32x64xi32>
    %41 = arith.muli %40, %38 : vector<32x64xi32>
    %42 = arith.cmpi eq, %39, %41 : vector<32x64xi32>
    %43 = arith.extui %42 : vector<32x64xi1> to vector<32x64xi32>
    %44 = arith.sitofp %43 : vector<32x64xi32> to vector<32x64xf32>
    %c2_i32_13 = arith.constant 2 : i32
    %45 = vector.broadcast %c2_i32_13 : i32 to vector<32x64xi32>
    %46 = arith.muli %45, %38 : vector<32x64xi32>
    %c1_i32_14 = arith.constant 1 : i32
    %47 = vector.broadcast %c1_i32_14 : i32 to vector<32x64xi32>
    %48 = arith.addi %46, %47 : vector<32x64xi32>
    %49 = arith.cmpi eq, %39, %48 : vector<32x64xi32>
    %50 = arith.extui %49 : vector<32x64xi1> to vector<32x64xi32>
    %51 = arith.sitofp %50 : vector<32x64xi32> to vector<32x64xf32>
    %cst_15 = arith.constant dense<0.000000e+00> : vector<32x16xf32>
    %52 = tpu.matmul %44, %37, %cst_15 {dimension_numbers = #tpu.dot_dimension_numbers<[1], [0], [0], [1], [0, 0, 1, 1], [], []>} : vector<32x64xf32>, vector<64x16xf32>, vector<32x16xf32> -> vector<32x16xf32>
    %cst_16 = arith.constant dense<0.000000e+00> : vector<32x16xf32>
    %53 = tpu.matmul %51, %37, %cst_16 {dimension_numbers = #tpu.dot_dimension_numbers<[1], [0], [0], [1], [0, 0, 1, 1], [], []>} : vector<32x64xf32>, vector<64x16xf32>, vector<32x16xf32> -> vector<32x16xf32>
    %54 = arith.maximumf %52, %53 : vector<32x16xf32>
    %c0_17 = arith.constant 0 : index
    %c0_18 = arith.constant 0 : index
    %55 = vector.load %arg5[%c0_17, %c0_18] : memref<32x16xf32, #tpu.memory_space<vmem>>, vector<32x16xf32>
    tpu.vector_store %arg5[%c0_17, %c0_18], %54 {strides = array<i32>} : memref<32x16xf32, #tpu.memory_space<vmem>>, vector<32x16xf32>,
    %c0_19 = arith.constant 0 : index
    %c0_20 = arith.constant 0 : index
    %56 = vector.load %arg2[%c0_19, %c0_20] : memref<32x16xf32, #tpu.memory_space<vmem>>, vector<32x16xf32>
    %cst_21 = arith.constant 0.000000e+00 : f32
    %57 = vector.broadcast %cst_21 : f32 to vector<32x16xf32>
    %58 = arith.cmpf ogt, %54, %57 : vector<32x16xf32>
    %59 = arith.extui %58 : vector<32x16xi1> to vector<32x16xi32>
    %60 = arith.sitofp %59 : vector<32x16xi32> to vector<32x16xf32>
    %61 = arith.subf %56, %54 : vector<32x16xf32>
    %62 = math.absf %61 : vector<32x16xf32>
    %63 = arith.mulf %62, %60 : vector<32x16xf32>
    %c0_22 = arith.constant 0 : index
    %c0_23 = arith.constant 0 : index
    %64 = vector.load %arg9[%c0_22, %c0_23] : memref<32x16xf32, #tpu.memory_space<vmem>>, vector<32x16xf32>
    tpu.vector_store %arg9[%c0_22, %c0_23], %63 {strides = array<i32>} : memref<32x16xf32, #tpu.memory_space<vmem>>, vector<32x16xf32>,
    %65 = vector.shape_cast %60 : vector<32x16xf32> to vector<1x32x16xf32>
    %cst_24 = arith.constant dense<0.000000e+00> : vector<1xf32>
    %66 = vector.multi_reduction <add>, %65, %cst_24 [1, 2] : vector<1x32x16xf32> to vector<1xf32>
    %67 = vector.shape_cast %66 : vector<1xf32> to vector<1x1x1xf32>
    %68 = vector.extract %67[0, 0, 0] : f32 from vector<1x1x1xf32>
    %69 = vector.shape_cast %63 : vector<32x16xf32> to vector<1x32x16xf32>
    %cst_25 = arith.constant dense<0.000000e+00> : vector<1xf32>
    %70 = vector.multi_reduction <add>, %69, %cst_25 [1, 2] : vector<1x32x16xf32> to vector<1xf32>
    %71 = vector.shape_cast %70 : vector<1xf32> to vector<1x1x1xf32>
    %72 = vector.extract %71[0, 0, 0] : f32 from vector<1x1x1xf32>
    %cst_26 = arith.constant 2.500000e-02 : f32
    %73 = arith.mulf %72, %cst_26 : f32
    %74 = arith.divf %73, %68 : f32
    %75 = arith.addf %20, %74 : f32
    %76 = tpu.iota {dimensions = array<i32: 0>} : vector<16x8xi32>
    %77 = tpu.iota {dimensions = array<i32: 1>} : vector<16x8xi32>
    %c2_i32_27 = arith.constant 2 : i32
    %78 = vector.broadcast %c2_i32_27 : i32 to vector<16x8xi32>
    %79 = arith.muli %78, %77 : vector<16x8xi32>
    %80 = arith.cmpi eq, %76, %79 : vector<16x8xi32>
    %81 = arith.extui %80 : vector<16x8xi1> to vector<16x8xi32>
    %82 = arith.sitofp %81 : vector<16x8xi32> to vector<16x8xf32>
    %c2_i32_28 = arith.constant 2 : i32
    %83 = vector.broadcast %c2_i32_28 : i32 to vector<16x8xi32>
    %84 = arith.muli %83, %77 : vector<16x8xi32>
    %c1_i32_29 = arith.constant 1 : i32
    %85 = vector.broadcast %c1_i32_29 : i32 to vector<16x8xi32>
    %86 = arith.addi %84, %85 : vector<16x8xi32>
    %87 = arith.cmpi eq, %76, %86 : vector<16x8xi32>
    %88 = arith.extui %87 : vector<16x8xi1> to vector<16x8xi32>
    %89 = arith.sitofp %88 : vector<16x8xi32> to vector<16x8xf32>
    %cst_30 = arith.constant dense<0.000000e+00> : vector<32x8xf32>
    %90 = tpu.matmul %54, %82, %cst_30 {dimension_numbers = #tpu.dot_dimension_numbers<[1], [0], [0], [1], [0, 0, 1, 1], [], []>} : vector<32x16xf32>, vector<16x8xf32>, vector<32x8xf32> -> vector<32x8xf32>
    %cst_31 = arith.constant dense<0.000000e+00> : vector<32x8xf32>
    %91 = tpu.matmul %54, %89, %cst_31 {dimension_numbers = #tpu.dot_dimension_numbers<[1], [0], [0], [1], [0, 0, 1, 1], [], []>} : vector<32x16xf32>, vector<16x8xf32>, vector<32x8xf32> -> vector<32x8xf32>
    %92 = arith.maximumf %90, %91 : vector<32x8xf32>
    %93 = tpu.iota {dimensions = array<i32: 0>} : vector<16x32xi32>
    %94 = tpu.iota {dimensions = array<i32: 1>} : vector<16x32xi32>
    %c2_i32_32 = arith.constant 2 : i32
    %95 = vector.broadcast %c2_i32_32 : i32 to vector<16x32xi32>
    %96 = arith.muli %95, %93 : vector<16x32xi32>
    %97 = arith.cmpi eq, %94, %96 : vector<16x32xi32>
    %98 = arith.extui %97 : vector<16x32xi1> to vector<16x32xi32>
    %99 = arith.sitofp %98 : vector<16x32xi32> to vector<16x32xf32>
    %c2_i32_33 = arith.constant 2 : i32
    %100 = vector.broadcast %c2_i32_33 : i32 to vector<16x32xi32>
    %101 = arith.muli %100, %93 : vector<16x32xi32>
    %c1_i32_34 = arith.constant 1 : i32
    %102 = vector.broadcast %c1_i32_34 : i32 to vector<16x32xi32>
    %103 = arith.addi %101, %102 : vector<16x32xi32>
    %104 = arith.cmpi eq, %94, %103 : vector<16x32xi32>
    %105 = arith.extui %104 : vector<16x32xi1> to vector<16x32xi32>
    %106 = arith.sitofp %105 : vector<16x32xi32> to vector<16x32xf32>
    %cst_35 = arith.constant dense<0.000000e+00> : vector<16x8xf32>
    %107 = tpu.matmul %99, %92, %cst_35 {dimension_numbers = #tpu.dot_dimension_numbers<[1], [0], [0], [1], [0, 0, 1, 1], [], []>} : vector<16x32xf32>, vector<32x8xf32>, vector<16x8xf32> -> vector<16x8xf32>
    %cst_36 = arith.constant dense<0.000000e+00> : vector<16x8xf32>
    %108 = tpu.matmul %106, %92, %cst_36 {dimension_numbers = #tpu.dot_dimension_numbers<[1], [0], [0], [1], [0, 0, 1, 1], [], []>} : vector<16x32xf32>, vector<32x8xf32>, vector<16x8xf32> -> vector<16x8xf32>
    %109 = arith.maximumf %107, %108 : vector<16x8xf32>
    %c0_37 = arith.constant 0 : index
    %c0_38 = arith.constant 0 : index
    %110 = vector.load %arg6[%c0_37, %c0_38] : memref<16x8xf32, #tpu.memory_space<vmem>>, vector<16x8xf32>
    tpu.vector_store %arg6[%c0_37, %c0_38], %109 {strides = array<i32>} : memref<16x8xf32, #tpu.memory_space<vmem>>, vector<16x8xf32>,
    %c0_39 = arith.constant 0 : index
    %c0_40 = arith.constant 0 : index
    %111 = vector.load %arg3[%c0_39, %c0_40] : memref<16x8xf32, #tpu.memory_space<vmem>>, vector<16x8xf32>
    %cst_41 = arith.constant 0.000000e+00 : f32
    %112 = vector.broadcast %cst_41 : f32 to vector<16x8xf32>
    %113 = arith.cmpf ogt, %109, %112 : vector<16x8xf32>
    %114 = arith.extui %113 : vector<16x8xi1> to vector<16x8xi32>
    %115 = arith.sitofp %114 : vector<16x8xi32> to vector<16x8xf32>
    %116 = arith.subf %111, %109 : vector<16x8xf32>
    %117 = math.absf %116 : vector<16x8xf32>
    %118 = arith.mulf %117, %115 : vector<16x8xf32>
    %c0_42 = arith.constant 0 : index
    %c0_43 = arith.constant 0 : index
    %119 = vector.load %arg10[%c0_42, %c0_43] : memref<16x8xf32, #tpu.memory_space<vmem>>, vector<16x8xf32>
    tpu.vector_store %arg10[%c0_42, %c0_43], %118 {strides = array<i32>} : memref<16x8xf32, #tpu.memory_space<vmem>>, vector<16x8xf32>,
    %120 = vector.shape_cast %115 : vector<16x8xf32> to vector<1x16x8xf32>
    %cst_44 = arith.constant dense<0.000000e+00> : vector<1xf32>
    %121 = vector.multi_reduction <add>, %120, %cst_44 [1, 2] : vector<1x16x8xf32> to vector<1xf32>
    %122 = vector.shape_cast %121 : vector<1xf32> to vector<1x1x1xf32>
    %123 = vector.extract %122[0, 0, 0] : f32 from vector<1x1x1xf32>
    %124 = vector.shape_cast %118 : vector<16x8xf32> to vector<1x16x8xf32>
    %cst_45 = arith.constant dense<0.000000e+00> : vector<1xf32>
    %125 = vector.multi_reduction <add>, %124, %cst_45 [1, 2] : vector<1x16x8xf32> to vector<1xf32>
    %126 = vector.shape_cast %125 : vector<1xf32> to vector<1x1x1xf32>
    %127 = vector.extract %126[0, 0, 0] : f32 from vector<1x1x1xf32>
    %cst_46 = arith.constant 1.250000e-02 : f32
    %128 = arith.mulf %127, %cst_46 : f32
    %129 = arith.divf %128, %123 : f32
    %130 = arith.addf %75, %129 : f32
    %131 = tpu.iota {dimensions = array<i32: 0>} : vector<8x4xi32>
    %132 = tpu.iota {dimensions = array<i32: 1>} : vector<8x4xi32>
    %c2_i32_47 = arith.constant 2 : i32
    %133 = vector.broadcast %c2_i32_47 : i32 to vector<8x4xi32>
    %134 = arith.muli %133, %132 : vector<8x4xi32>
    %135 = arith.cmpi eq, %131, %134 : vector<8x4xi32>
    %136 = arith.extui %135 : vector<8x4xi1> to vector<8x4xi32>
    %137 = arith.sitofp %136 : vector<8x4xi32> to vector<8x4xf32>
    %c2_i32_48 = arith.constant 2 : i32
    %138 = vector.broadcast %c2_i32_48 : i32 to vector<8x4xi32>
    %139 = arith.muli %138, %132 : vector<8x4xi32>
    %c1_i32_49 = arith.constant 1 : i32
    %140 = vector.broadcast %c1_i32_49 : i32 to vector<8x4xi32>
    %141 = arith.addi %139, %140 : vector<8x4xi32>
    %142 = arith.cmpi eq, %131, %141 : vector<8x4xi32>
    %143 = arith.extui %142 : vector<8x4xi1> to vector<8x4xi32>
    %144 = arith.sitofp %143 : vector<8x4xi32> to vector<8x4xf32>
    %cst_50 = arith.constant dense<0.000000e+00> : vector<16x4xf32>
    %145 = tpu.matmul %109, %137, %cst_50 {dimension_numbers = #tpu.dot_dimension_numbers<[1], [0], [0], [1], [0, 0, 1, 1], [], []>} : vector<16x8xf32>, vector<8x4xf32>, vector<16x4xf32> -> vector<16x4xf32>
    %cst_51 = arith.constant dense<0.000000e+00> : vector<16x4xf32>
    %146 = tpu.matmul %109, %144, %cst_51 {dimension_numbers = #tpu.dot_dimension_numbers<[1], [0], [0], [1], [0, 0, 1, 1], [], []>} : vector<16x8xf32>, vector<8x4xf32>, vector<16x4xf32> -> vector<16x4xf32>
    %147 = arith.maximumf %145, %146 : vector<16x4xf32>
    %148 = tpu.iota {dimensions = array<i32: 0>} : vector<8x16xi32>
    %149 = tpu.iota {dimensions = array<i32: 1>} : vector<8x16xi32>
    %c2_i32_52 = arith.constant 2 : i32
    %150 = vector.broadcast %c2_i32_52 : i32 to vector<8x16xi32>
    %151 = arith.muli %150, %148 : vector<8x16xi32>
    %152 = arith.cmpi eq, %149, %151 : vector<8x16xi32>
    %153 = arith.extui %152 : vector<8x16xi1> to vector<8x16xi32>
    %154 = arith.sitofp %153 : vector<8x16xi32> to vector<8x16xf32>
    %c2_i32_53 = arith.constant 2 : i32
    %155 = vector.broadcast %c2_i32_53 : i32 to vector<8x16xi32>
    %156 = arith.muli %155, %148 : vector<8x16xi32>
    %c1_i32_54 = arith.constant 1 : i32
    %157 = vector.broadcast %c1_i32_54 : i32 to vector<8x16xi32>
    %158 = arith.addi %156, %157 : vector<8x16xi32>
    %159 = arith.cmpi eq, %149, %158 : vector<8x16xi32>
    %160 = arith.extui %159 : vector<8x16xi1> to vector<8x16xi32>
    %161 = arith.sitofp %160 : vector<8x16xi32> to vector<8x16xf32>
    %cst_55 = arith.constant dense<0.000000e+00> : vector<8x4xf32>
    %162 = tpu.matmul %154, %147, %cst_55 {dimension_numbers = #tpu.dot_dimension_numbers<[1], [0], [0], [1], [0, 0, 1, 1], [], []>} : vector<8x16xf32>, vector<16x4xf32>, vector<8x4xf32> -> vector<8x4xf32>
    %cst_56 = arith.constant dense<0.000000e+00> : vector<8x4xf32>
    %163 = tpu.matmul %161, %147, %cst_56 {dimension_numbers = #tpu.dot_dimension_numbers<[1], [0], [0], [1], [0, 0, 1, 1], [], []>} : vector<8x16xf32>, vector<16x4xf32>, vector<8x4xf32> -> vector<8x4xf32>
    %164 = arith.maximumf %162, %163 : vector<8x4xf32>
    %c0_57 = arith.constant 0 : index
    %c0_58 = arith.constant 0 : index
    %165 = vector.load %arg7[%c0_57, %c0_58] : memref<8x4xf32, #tpu.memory_space<vmem>>, vector<8x4xf32>
    tpu.vector_store %arg7[%c0_57, %c0_58], %164 {strides = array<i32>} : memref<8x4xf32, #tpu.memory_space<vmem>>, vector<8x4xf32>,
    %c0_59 = arith.constant 0 : index
    %c0_60 = arith.constant 0 : index
    %166 = vector.load %arg4[%c0_59, %c0_60] : memref<8x4xf32, #tpu.memory_space<vmem>>, vector<8x4xf32>
    %cst_61 = arith.constant 0.000000e+00 : f32
    %167 = vector.broadcast %cst_61 : f32 to vector<8x4xf32>
    %168 = arith.cmpf ogt, %164, %167 : vector<8x4xf32>
    %169 = arith.extui %168 : vector<8x4xi1> to vector<8x4xi32>
    %170 = arith.sitofp %169 : vector<8x4xi32> to vector<8x4xf32>
    %171 = arith.subf %166, %164 : vector<8x4xf32>
    %172 = math.absf %171 : vector<8x4xf32>
    %173 = arith.mulf %172, %170 : vector<8x4xf32>
    %c0_62 = arith.constant 0 : index
    %c0_63 = arith.constant 0 : index
    %174 = vector.load %arg11[%c0_62, %c0_63] : memref<8x4xf32, #tpu.memory_space<vmem>>, vector<8x4xf32>
    tpu.vector_store %arg11[%c0_62, %c0_63], %173 {strides = array<i32>} : memref<8x4xf32, #tpu.memory_space<vmem>>, vector<8x4xf32>,
    %175 = vector.shape_cast %170 : vector<8x4xf32> to vector<1x8x4xf32>
    %cst_64 = arith.constant dense<0.000000e+00> : vector<1xf32>
    %176 = vector.multi_reduction <add>, %175, %cst_64 [1, 2] : vector<1x8x4xf32> to vector<1xf32>
    %177 = vector.shape_cast %176 : vector<1xf32> to vector<1x1x1xf32>
    %178 = vector.extract %177[0, 0, 0] : f32 from vector<1x1x1xf32>
    %179 = vector.shape_cast %173 : vector<8x4xf32> to vector<1x8x4xf32>
    %cst_65 = arith.constant dense<0.000000e+00> : vector<1xf32>
    %180 = vector.multi_reduction <add>, %179, %cst_65 [1, 2] : vector<1x8x4xf32> to vector<1xf32>
    %181 = vector.shape_cast %180 : vector<1xf32> to vector<1x1x1xf32>
    %182 = vector.extract %181[0, 0, 0] : f32 from vector<1x1x1xf32>
    %cst_66 = arith.constant 6.250000e-03 : f32
    %183 = arith.mulf %182, %cst_66 : f32
    %184 = arith.divf %183, %178 : f32
    %185 = arith.addf %130, %184 : f32
    %186 = vector.broadcast %185 : f32 to vector<1x1xf32>
    %c0_67 = arith.constant 0 : index
    %c0_68 = arith.constant 0 : index
    %187 = vector.load %arg12[%c0_67, %c0_68] : memref<1x1xf32, #tpu.memory_space<vmem>>, vector<1x1xf32>
    tpu.vector_store %arg12[%c0_67, %c0_68], %186 {strides = array<i32>} : memref<1x1xf32, #tpu.memory_space<vmem>>, vector<1x1xf32>,
    return
  }
}

</mosaic_0001>

<bundles_post_ra>
// kernel: stereo_supervised_without_occmask_loss.1
= control target key start
LH: loop header
LB: loop body
LE: loop exit
PB: predicated region body
PF: predicated region fallthrough
CT: control target
= control target key end

     0   :  { %18 = vsyncpa [#allocation3], 0  ;;  %s2919_s0 = inlined_call_operand.hbm [shape: f32[64,32], index: 0, kind: input, shape index: {}]   ;;  %s2920_s1 = inlined_call_operand.hbm [shape: f32[64,32], index: 1, kind: input, shape index: {}]   ;;  %s2921_s2 = inlined_call_operand.hbm [shape: f32[32,16], index: 2, kind: input, shape index: {}]   ;;  %s2922_s3 = inlined_call_operand.vmem [shape: f32[16,8], index: 3, kind: input, shape index: {}]   ;;  %s2923_s4 = inlined_call_operand.vmem [shape: f32[8,4], index: 4, kind: input, shape index: {}]   ;;  %s2924_s5 = inlined_call_operand.hbm [shape: f32[32,16], index: 5, kind: output, shape index: {0}]   ;;  %s2925_s6 = inlined_call_operand.hbm [shape: f32[16,8], index: 6, kind: output, shape index: {1}]   ;;  %s2926_s7 = inlined_call_operand.hbm [shape: f32[8,4], index: 7, kind: output, shape index: {2}]   ;;  %s2927_s8 = inlined_call_operand.hbm [shape: f32[64,32], index: 8, kind: output, shape index: {3}]   ;;  %s2928_s9 = inlined_call_operand.hbm [shape: f32[32,16], index: 9, kind: output, shape index: {4}]   ;;  %s2929_s10 = inlined_call_operand.hbm [shape: f32[16,8], index: 10, kind: output, shape index: {5}]   ;;  %s2930_s11 = inlined_call_operand.hbm [shape: f32[8,4], index: 11, kind: output, shape index: {6}]   ;;  %s2931_s12 = inlined_call_operand.hbm [shape: f32[1,1], index: 12, kind: output, shape index: {7}]  }
   0x1   :  { %19 = vsyncpa [#allocation6], 0 }
   0x2   :  { %20 = vsyncpa [#allocation4], 0 }
   0x3   :  { %21 = vsyncpa [#allocation10], 0 }
   0x4   :  { %22 = vsyncpa [#allocation13], 0 }
   0x5   :  { %23 = vsyncpa [#allocation16], 0 }
   0x6   :  { %24 = vsyncpa [#allocation19], 0  ;;  %s2345_s21 = smov [#allocation5]   ;;  %s2346_s23 = smov [#allocation2]  }
   0x7   :  { %s42_s22 = sshll.u32 %s2345_s21, 4  ;;  %s30_s24 = sshll.u32 %s2346_s23, 4  ;;  %s43_s22 = int_to_ptr.vmem [resolvable:$true] %s42_s22  ;;  %s2428_s24 = int_to_ptr.vmem [resolvable:$true] %s30_s24 }
   0x8   :  { %s2089_s27 = scalar_lea.hbm %s2920_s1, 1024 }
   0x9   :  { %p2090_p0 = scmp.ne.s32.totalorder %s2920_s1, %s2089_s27  ;;  %p2093_p1 = scmp.lt.u32.totalorder %s2089_s27, %s2920_s1 }
   0xb   :  { %p2095_p2 = pnand %p2093_p1, %p2090_p0 }
   0xd   :  { %2098 = shalt.err (!%p2095_p2)
}
   0xe   :  { %s2099_s14 = scalar_lea.vmem %s43_s22, 1024  ;;  %p2104_p4 = scmp.lt.s32.totalorder %s43_s22, %s43_s22 }
   0xf   :  { %p2100_p3 = scmp.ne.s32.totalorder %s43_s22, %s2099_s14  ;;  %p2105_p5 = scmp.lt.s32.totalorder %s2099_s14, %s2099_s14 }
  0x11   :  { %p2106_p6 = por %p2105_p5, %p2104_p4 }
  0x13   :  { %p2107_p7 = pnand %p2106_p6, %p2100_p3 }
  0x15   :  { %2110 = shalt.err (!%p2107_p7)
}
  0x16   :  { %s2347_s15 = smov 128   ;;  %s2348_s16 = smov 8  }
  0x17   :  { %48 = dma.hbm_to_vmem [thread:$0]  %s2920_s1, 1024, %s43_s22, [#allocation6], %s2347_s15, %s2347_s15, %s2348_s16  }
  0x18   :  { %s2111_s21 = scalar_lea.hbm %s2919_s0, 1024 }
  0x19   :  { %p2112_p8 = scmp.ne.s32.totalorder %s2919_s0, %s2111_s21  ;;  %p2115_p9 = scmp.lt.u32.totalorder %s2111_s21, %s2919_s0 }
  0x1b   :  { %p2117_p10 = pnand %p2115_p9, %p2112_p8 }
  0x1d   :  { %2120 = shalt.err (!%p2117_p10)
}
  0x1e   :  { %s2121_s28 = scalar_lea.vmem %s2428_s24, 1024  ;;  %p2126_p12 = scmp.lt.s32.totalorder %s2428_s24, %s2428_s24 }
  0x1f   :  { %p2122_p11 = scmp.ne.s32.totalorder %s2428_s24, %s2121_s28  ;;  %p2127_p13 = scmp.lt.s32.totalorder %s2121_s28, %s2121_s28 }
  0x21   :  { %p2128_p0 = por %p2127_p13, %p2126_p12 }
  0x23   :  { %p2129_p1 = pnand %p2128_p0, %p2122_p11 }
  0x25   :  { %2132 = shalt.err (!%p2129_p1)
}
  0x26   :  { %36 = dma.hbm_to_vmem [thread:$0]  %s2919_s0, 1024, %s2428_s24, [#allocation3], %s2347_s15, %s2347_s15, %s2348_s16  }
  0x27   :  { %s2349_s29 = smov [#allocation7]   ;;  %s2133_s17 = scalar_lea.hbm %s2921_s2, 512 }
  0x28   :  { %s54_s30 = sshll.u32 %s2349_s29, 4  ;;  %p2134_p2 = scmp.ne.s32.totalorder %s2921_s2, %s2133_s17  ;;  %s55_s30 = int_to_ptr.vmem [resolvable:$true] %s54_s30 }
  0x29   :  { %p2137_p3 = scmp.lt.u32.totalorder %s2133_s17, %s2921_s2 }
  0x2b   :  { %p2139_p4 = pnand %p2137_p3, %p2134_p2 }
  0x2d   :  { %2142 = shalt.err (!%p2139_p4)
}
  0x2e   :  { %s2143_s23 = scalar_lea.vmem %s55_s30, 512  ;;  %p2148_p6 = scmp.lt.s32.totalorder %s55_s30, %s55_s30 }
  0x2f   :  { %p2144_p5 = scmp.ne.s32.totalorder %s55_s30, %s2143_s23  ;;  %p2149_p7 = scmp.lt.s32.totalorder %s2143_s23, %s2143_s23 }
  0x31   :  { %p2150_p8 = por %p2149_p7, %p2148_p6 }
  0x33   :  { %p2151_p9 = pnand %p2150_p8, %p2144_p5 }
  0x35   :  { %2154 = shalt.err (!%p2151_p9)
}
  0x36   :  { %60 = dma.hbm_to_vmem [thread:$0]  %s2921_s2, 512, %s55_s30, [#allocation6], %s2347_s15, %s2347_s15, %s2348_s16  }
  0x37   :  { %2331 = dma.done.wait [#allocation3], 1024  }
  0x38   :  { %2332 = vsyncadd [#allocation3], 4294966272 }
  0x39   :  { %2333 = dma.done.wait [#allocation6], 1536  }
  0x3a   :  { %2334 = vsyncadd [#allocation6], 4294965760  ;;  %v201_v0 = vlaneseq  ;;  %vm138_vm0 = vcmask 261120   ;;  %v74_v9 = vld [vmem:[#allocation2] sm:$0xff]  ;;  %v2350_v11 = vmov 1.0|1.0  }
  0x3b   :  { %v82_v10 = vld [vmem:[#allocation5] sm:$0xff]  ;;  %v75_v13 = vld [vmem:[#allocation2 + $0x8] sm:$0xff]  ;;  %vm90_vm12 = vcmp.gt.f32.partialorder %v74_v9, 0.0  ;;  %1819 = vmatprep.mubr.msk.f32.mxu0 %vm138_vm0, %v74_v9  ;;  %v76_v18 = vld [vmem:[#allocation2 + $0x10] sm:$0xff]  ;;  %v2351_v21 = vmov 0.0   ;;  %1839 = vmatprep.mubr.msk.f32.mxu1 %vm138_vm0, %v74_v9  ;;  %s2355_s0 = smov [#allocation9]  }
  0x3c   :  { %v2480_v1 = vshrl.u32 %v201_v0, 7  ;;  %v2482_v2 = vand.u32 127, %v201_v0  ;;  %v83_v14 = vld [vmem:[#allocation5 + $0x8] sm:$0xff]  ;;  %v114_v16 = vsub.f32 %v82_v10, %v74_v9  ;;  %vm91_vm13 = vcmp.gt.f32.partialorder %v75_v13, 0.0  ;;  %v84_v19 = vld [vmem:[#allocation5 + $0x10] sm:$0xff]  ;;  %v85_v25 = vld [vmem:[#allocation5 + $0x18] sm:$0xff] }
  0x3d   :  { %v115_v17 = vsub.f32 %v83_v14, %v75_v13  ;;  %v1640_v22 = vsel %vm90_vm12, 1.0, %v2351_v21  ;;  %v1641_v23 = vsel %vm91_vm13, 1.0, %v2351_v21  ;;  %vm92_vm15 = vcmp.gt.f32.partialorder %v76_v18, 0.0  ;;  %v77_v35 = vld [vmem:[#allocation2 + $0x18] sm:$0xff]  ;;  %v78_v44 = vld [vmem:[#allocation2 + $0x20] sm:$0xff]  ;;  %v79_v45 = vld [vmem:[#allocation2 + $0x28] sm:$0xff] }
  0x3e   :  { %v2485_v3 = vadd.s32 8, %v2480_v1  ;;  %v2488_v4 = vmul.u32 2, %v2482_v2  ;;  %v2491_v5 = vadd.s32 16, %v2480_v1  ;;  %v2494_v6 = vadd.s32 24, %v2480_v1  ;;  %v80_v46 = vld [vmem:[#allocation2 + $0x30] sm:$0xff]  ;;  %v81_v47 = vld [vmem:[#allocation2 + $0x38] sm:$0xff] }
  0x3f   :  { %v116_v24 = vsub.f32 %v84_v19, %v76_v18  ;;  %v122_v26 = vand.u32 2147483647, %v114_v16  ;;  %v147_v27 = vsel %vm138_vm0, %v1640_v22, 0.0  ;;  %v123_v28 = vand.u32 2147483647, %v115_v17  ;;  %v86_v49 = vld [vmem:[#allocation5 + $0x20] sm:$0xff] }
  0x40   :  { %vm209_vm1 = vcmp.eq.s32.totalorder %v2480_v1, %v2488_v4  ;;  %vm210_vm2 = vcmp.eq.s32.totalorder %v2485_v3, %v2488_v4  ;;  %v2501_v7 = vadd.s32 1, %v2488_v4  ;;  %vm211_vm3 = vcmp.eq.s32.totalorder %v2491_v5, %v2488_v4  ;;  %v87_v51 = vld [vmem:[#allocation5 + $0x28] sm:$0xff]  ;;  %v88_v59 = vld [vmem:[#allocation5 + $0x30] sm:$0xff]  ;;  %v89_v60 = vld [vmem:[#allocation5 + $0x38] sm:$0xff]  ;;  %s1536_s24 = sshll.u32 %s2355_s0, 4  ;;  %s1537_s24 = int_to_ptr.vmem [resolvable:$true] %s1536_s24 }
  0x41   :  { %vm2508_vm4 = vmpackc.low %vm210_vm2, %vm209_vm1  ;;  %vm212_vm5 = vcmp.eq.s32.totalorder %v2494_v6, %v2488_v4  ;;  %v148_v29 = vsel %vm138_vm0, %v1641_v23, 0.0  ;;  %v124_v31 = vand.u32 2147483647, %v116_v24  ;;  %v130_v32 = vmul.f32 %v1640_v22, %v122_v26  ;;  %p2160_p11 = scmp.lt.s32.totalorder %s1537_s24, %s1537_s24 }
  0x42   :  { %1962 = vmatprep.subr.msk.bf16.mxu0 %vm2508_vm4, %v2350_v11  ;;  %vm222_vm6 = vcmp.eq.s32.totalorder %v2480_v1, %v2501_v7  ;;  %vm223_vm7 = vcmp.eq.s32.totalorder %v2485_v3, %v2501_v7  ;;  %vm2521_vm8 = vmpackc.low %vm212_vm5, %vm211_vm3  ;;  %vm224_vm9 = vcmp.eq.s32.totalorder %v2491_v5, %v2501_v7  ;;  %vm225_vm10 = vcmp.eq.s32.totalorder %v2494_v6, %v2501_v7 }
  0x43   :  { %1964 = vmatpush3.bf16.msk.msra.mxu0 %vm2508_vm4, %v2350_v11  ;;  %vm2535_vm11 = vmpackc.low %vm223_vm7, %vm222_vm6  ;;  %v2564_v30 = vadd.f32 %v148_v29, %v147_v27  ;;  %v131_v33 = vmul.f32 %v1641_v23, %v123_v28  ;;  %v1642_v34 = vsel %vm92_vm15, 1.0, %v2351_v21  ;;  %vm93_vm2 = vcmp.gt.f32.partialorder %v77_v35, 0.0  ;;  %139 = vst.msk [vmem:[#allocation12] sm:$0xff] %vm138_vm0, %v130_v32 }
  0x44   :  { %1970 = vmatprep.subr.msk.bf16.mxu1 %vm2535_vm11, %v2350_v11  ;;  %1966 = vmatprep.subr.msk.bf16.mxu0 %vm2521_vm8, %v2350_v11  ;;  %vm2549_vm14 = vmpackc.low %vm225_vm10, %vm224_vm9  ;;  %v2570_v36 = vmul.f32 %v1642_v34, %v124_v31  ;;  %v117_v37 = vsub.f32 %v85_v25, %v77_v35  ;;  %v171_v38 = vsel %vm138_vm0, %v130_v32, 0.0  ;;  %v1643_v42 = vsel %vm93_vm2, 1.0, %v2351_v21 }
  0x45   :  { %1972 = vmatpush3.bf16.msk.msra.mxu1 %vm2535_vm11, %v2350_v11  ;;  %140 = vst.msk [vmem:[#allocation12 + $0x8] sm:$0xff] %vm138_vm0, %v131_v33  ;;  %v172_v39 = vsel %vm138_vm0, %v131_v33, 0.0  ;;  %v476_v48 = vmul.u32 2, %v2480_v1  ;;  %vm508_vm5 = vcmask 523264   ;;  %v118_v52 = vsub.f32 %v86_v49, %v78_v44 }
  0x46   :  { %1974 = vmatprep.subr.msk.bf16.mxu1 %vm2549_vm14, %v2350_v11  ;;  %v2579_v40 = vadd.f32 %v172_v39, %v171_v38  ;;  %141 = vst.msk [vmem:[#allocation12 + $0x10] sm:$0xff] %vm138_vm0, %v2570_v36  ;;  %v125_v41 = vand.u32 2147483647, %v117_v37  ;;  %v119_v55 = vsub.f32 %v87_v51, %v79_v45  ;;  %v150_v58 = vsel %vm138_vm0, %v1642_v34, 0.0 }
  0x47   :  { %1968 = vmatpush3.bf16.msk.msra.mxu0 %vm2521_vm8, %v2350_v11  ;;  %v492_v50 = vadd.s32 1, %v476_v48  ;;  %vm480_vm3 = vcmp.eq.s32.totalorder %v2482_v2, %v476_v48  ;;  %vm94_vm8 = vcmp.gt.f32.partialorder %v78_v44, 0.0  ;;  %v126_v56 = vand.u32 2147483647, %v118_v52 }
  0x48   :  { %v2587_v43 = vmul.f32 %v1643_v42, %v125_v41  ;;  %v2606_v53 = vsel %vm480_vm3, 1.0, %v2351_v21  ;;  %v127_v57 = vand.u32 2147483647, %v119_v55  ;;  %vm95_vm9 = vcmp.gt.f32.partialorder %v79_v45, 0.0 }
  0x49   :  { %1976 = vmatpush3.bf16.msk.msra.mxu1 %vm2549_vm14, %v2350_v11  ;;  %vm496_vm7 = vcmp.eq.s32.totalorder %v2482_v2, %v492_v50  ;;  %vm96_vm10 = vcmp.gt.f32.partialorder %v80_v46, 0.0  ;;  %vm97_vm12 = vcmp.gt.f32.partialorder %v81_v47, 0.0  ;;  %v1644_v61 = vsel %vm94_vm8, 1.0, %v2351_v21 }
  0x4a   :  { %1820 = vmatmul.mubr.msk.f32.vlgmr.msra.gmra.mrb[0].mxu0 %vm138_vm0, %v75_v13  ;;  %142 = vst.msk [vmem:[#allocation12 + $0x18] sm:$0xff] %vm138_vm0, %v2587_v43  ;;  %v2609_v54 = vsel %vm496_vm7, 1.0, %v2351_v21  ;;  %v1645_v62 = vsel %vm95_vm9, 1.0, %v2351_v21  ;;  %v120_v63 = vsub.f32 %v88_v59, %v80_v46  ;;  %v121_v0 = vsub.f32 %v89_v60, %v81_v47 }
  0x4b   :  { %1822 = vmatprep.mubr.msk.f32.mxu0 %vm138_vm0, %v76_v18  ;;  %v2618_v9 = vmul.f32 %v1644_v61, %v126_v56  ;;  %v2620_v10 = vmul.f32 %v1645_v62, %v127_v57  ;;  %v151_v12 = vadd.f32 %v150_v58, %v2564_v30  ;;  %v154_v17 = vsel %vm138_vm0, %v1644_v61, 0.0 }
  0x4c   :  { %1840 = vmatmul.mubr.msk.f32.vlgmr.msra.gmra.mrb[0].mxu1 %vm138_vm0, %v75_v13  ;;  %v152_v13 = vsel %vm138_vm0, %v1643_v42, 0.0  ;;  %v128_v14 = vand.u32 2147483647, %v120_v63  ;;  %v129_v16 = vand.u32 2147483647, %v121_v0  ;;  %v1647_v19 = vsel %vm97_vm12, 1.0, %v2351_v21 }
  0x4d   :  { %1842 = vmatprep.mubr.msk.f32.mxu1 %vm138_vm0, %v76_v18  ;;  %143 = vst.msk [vmem:[#allocation12 + $0x20] sm:$0xff] %vm138_vm0, %v2618_v9  ;;  %v1646_v18 = vsel %vm96_vm10, 1.0, %v2351_v21  ;;  %144 = vst.msk [vmem:[#allocation12 + $0x28] sm:$0xff] %vm138_vm0, %v2620_v10  ;;  %v153_v20 = vadd.f32 %v152_v13, %v151_v12  ;;  %v156_v24 = vsel %vm138_vm0, %v1645_v62, 0.0  ;;  %v160_v28 = vsel %vm138_vm0, %v1647_v19, 0.0 }
  0x4e   :  { %1823 = vmatmul.mubr.msk.f32.gmra.mrb[2].mxu0 %vm138_vm0, %v77_v35  ;;  %v2631_v22 = vmul.f32 %v1646_v18, %v128_v14  ;;  %v2633_v23 = vmul.f32 %v1647_v19, %v129_v16  ;;  %v158_v26 = vsel %vm138_vm0, %v1646_v18, 0.0  ;;  %v477_v51 = vmul.u32 2, %v2485_v3 }
  0x4f   :  { %1825 = vmatprep.mubr.msk.f32.mxu0 %vm138_vm0, %v78_v44  ;;  %v155_v25 = vadd.f32 %v154_v17, %v153_v20  ;;  %v478_v56 = vmul.u32 2, %v2491_v5  ;;  %v479_v63 = vmul.u32 2, %v2494_v6  ;;  %v174_v20 = vsel %vm138_vm0, %v2570_v36, 0.0 }
  0x50   :  { %1843 = vmatmul.mubr.msk.f32.gmra.mrb[2].mxu1 %vm138_vm0, %v77_v35  ;;  %145 = vst.msk [vmem:[#allocation12 + $0x30] sm:$0xff] %vm138_vm0, %v2631_v22  ;;  %146 = vst.msk [vmem:[#allocation12 + $0x38] sm:$0xff] %vm138_vm0, %v2633_v23  ;;  %v493_v62 = vadd.s32 1, %v477_v51  ;;  %vm481_vm13 = vcmp.eq.s32.totalorder %v2482_v2, %v477_v51  ;;  %v178_v8 = vsel %vm138_vm0, %v2618_v9, 0.0  ;;  %v184_v36 = vsel %vm138_vm0, %v2633_v23, 0.0 }
  0x51   :  { %1845 = vmatprep.mubr.msk.f32.mxu1 %vm138_vm0, %v78_v44  ;;  %v157_v27 = vadd.f32 %v156_v24, %v155_v25  ;;  %v494_v13 = vadd.s32 1, %v478_v56  ;;  %v495_v14 = vadd.s32 1, %v479_v63  ;;  %vm482_vm15 = vcmp.eq.s32.totalorder %v2482_v2, %v478_v56 }
  0x52   :  { %1826 = vmatmul.mubr.msk.f32.gmra.mrb[4].mxu0 %vm138_vm0, %v79_v45  ;;  %vm497_vm14 = vcmp.eq.s32.totalorder %v2482_v2, %v493_v62  ;;  %v2650_v6 = vsel %vm481_vm13, 1.0, %v2351_v21  ;;  %v1682_v17 = vsel %vm482_vm15, 1.0, %v2351_v21  ;;  %vm483_vm3 = vcmp.eq.s32.totalorder %v2482_v2, %v479_v63 }
  0x53   :  { %1828 = vmatprep.mubr.msk.f32.mxu0 %vm138_vm0, %v80_v46  ;;  %v159_v29 = vadd.f32 %v158_v26, %v157_v27  ;;  %vm498_vm2 = vcmp.eq.s32.totalorder %v2482_v2, %v494_v13  ;;  %v2653_v16 = vsel %vm497_vm14, 1.0, %v2351_v21  ;;  %vm499_vm7 = vcmp.eq.s32.totalorder %v2482_v2, %v495_v14 }
  0x54   :  { %1846 = vmatmul.mubr.msk.f32.gmra.mrb[4].mxu1 %vm138_vm0, %v79_v45  ;;  %v1686_v18 = vsel %vm498_vm2, 1.0, %v2351_v21  ;;  %v1683_v2 = vsel %vm483_vm3, 1.0, %v2351_v21  ;;  %v1687_v19 = vsel %vm499_vm7, 1.0, %v2351_v21  ;;  %v175_v24 = vadd.f32 %v174_v20, %v2579_v40 }
  0x55   :  { %1848 = vmatprep.mubr.msk.f32.mxu1 %vm138_vm0, %v80_v46  ;;  %v161_v30 = vadd.f32 %v160_v28, %v159_v29  ;;  %v176_v25 = vsel %vm138_vm0, %v2587_v43, 0.0  ;;  %v182_v28 = vsel %vm138_vm0, %v2631_v22, 0.0  ;;  %vm2354_vm10 = vmmov 0  }
  0x56   :  { %1829 = vmatmul.mubr.msk.f32.gmra.mrb[6].mxu0 %vm138_vm0, %v81_v47  ;;  %v177_v26 = vadd.f32 %v176_v25, %v175_v24  ;;  %vm1480_vm12 = vcmask 31744  }
  0x57   :  { %1867 = vmatprep.mubr.msk.f32.mxu0 %vm508_vm5, %v2606_v53  ;;  %162 = vadd.xlane.f32.xlu0 %v161_v30 }
  0x58   :  { %1849 = vmatmul.mubr.msk.f32.gmra.mrb[6].mxu1 %vm138_vm0, %v81_v47  ;;  %v179_v27 = vadd.f32 %v178_v8, %v177_v26 }
  0x59   :  { %1889 = vmatprep.mubr.msk.f32.mxu1 %vm508_vm5, %v2609_v54 }
  0xe4   :  { %v163_v30 = vpop.xlane.xlu0 %162 }
  0xe5   :  { %v164_v43 = vrot.slane %v163_v30, 4 }
 0x11d   :  { %v1821_v31 = vpop.f32.mrb[0].mxu0 }
 0x11e   :  { %v324_v32 = vpop.f32.mrb[1].mxu0 }
 0x11f   :  { %v1841_v33 = vpop.f32.mrb[0].mxu1 }
 0x120   :  { %v469_v34 = vmax.f32 %v1821_v31, %v1841_v33  ;;  %v429_v35 = vpop.f32.mrb[1].mxu1  ;;  %v165_v31 = vadd.f32 %v164_v43, %v163_v30 }
 0x121   :  { %v468_v37 = vmax.f32 %v324_v32, %v429_v35  ;;  %v1824_v38 = vpop.f32.mrb[2].mxu0 }
 0x122   :  { %v334_v39 = vpop.f32.mrb[3].mxu0  ;;  %v166_v32 = vrot.slane %v165_v31, 2 }
 0x123   :  { %v1977_v41 = vpack.c.bf16 %v469_v34, %v468_v37  ;;  %v1844_v42 = vpop.f32.mrb[2].mxu1  ;;  %v713_v37 = vld [vmem:[#allocation7 + $0x8] sm:$0xff] }
 0x124   :  { %v471_v44 = vmax.f32 %v1824_v38, %v1844_v42  ;;  %v439_v45 = vpop.f32.mrb[3].mxu1  ;;  %v167_v33 = vadd.f32 %v166_v32, %v165_v31 }
 0x125   :  { %v470_v46 = vmax.f32 %v334_v39, %v439_v45  ;;  %1978 = vmatprep.subr.bf16.mxu0 %v1977_v41  ;;  %1994 = vmatprep.subr.bf16.mxu1 %v1977_v41  ;;  %v1827_v47 = vpop.f32.mrb[4].mxu0 }
 0x126   :  { %1980 = vmatpush3.bf16.msra.mxu0 %v1977_v41  ;;  %1996 = vmatpush3.bf16.msra.mxu1 %v1977_v41  ;;  %v344_v48 = vpop.f32.mrb[5].mxu0  ;;  %v168_v9 = vrot.slane %v167_v33, 1  ;;  %v712_v41 = vld [vmem:[#allocation7] sm:$0xff] }
 0x127   :  { %v1981_v49 = vpack.c.bf16 %v471_v44, %v470_v46  ;;  %v1847_v50 = vpop.f32.mrb[4].mxu1  ;;  %v714_v46 = vld [vmem:[#allocation7 + $0x10] sm:$0xff] }
 0x128   :  { %v473_v52 = vmax.f32 %v1827_v47, %v1847_v50  ;;  %v449_v55 = vpop.f32.mrb[5].mxu1  ;;  %v169_v34 = vadd.f32 %v168_v9, %v167_v33  ;;  %v715_v47 = vld [vmem:[#allocation7 + $0x18] sm:$0xff] }
 0x129   :  { %v472_v57 = vmax.f32 %v344_v48, %v449_v55  ;;  %1982 = vmatprep.subr.bf16.mxu0 %v1981_v49  ;;  %1998 = vmatprep.subr.bf16.mxu1 %v1981_v49  ;;  %v1830_v58 = vpop.f32.mrb[6].mxu0 }
 0x12a   :  { %1984 = vmatpush3.bf16.msra.mxu0 %v1981_v49  ;;  %2000 = vmatpush3.bf16.msra.mxu1 %v1981_v49  ;;  %v354_v59 = vpop.f32.mrb[7].mxu0  ;;  %2039 = vpush %v169_v34 }
 0x12b   :  { %v1985_v60 = vpack.c.bf16 %v473_v52, %v472_v57  ;;  %v1850_v61 = vpop.f32.mrb[6].mxu1 }
 0x12c   :  { %v475_v0 = vmax.f32 %v1830_v58, %v1850_v61  ;;  %v459_v12 = vpop.f32.mrb[7].mxu1 }
 0x12d   :  { %v474_v3 = vmax.f32 %v354_v59, %v459_v12  ;;  %1986 = vmatprep.subr.bf16.mxu0 %v1985_v60  ;;  %2002 = vmatprep.subr.bf16.mxu1 %v1985_v60 }
 0x12e   :  { %1988 = vmatpush3.bf16.msra.mxu0 %v1985_v60  ;;  %2004 = vmatpush3.bf16.msra.mxu1 %v1985_v60 }
 0x12f   :  { %v1989_v5 = vpack.c.bf16 %v475_v0, %v474_v3 }
 0x131   :  { %1990 = vmatprep.subr.bf16.mxu0 %v1989_v5  ;;  %2006 = vmatprep.subr.bf16.mxu1 %v1989_v5 }
 0x132   :  { %1992 = vmatpush3.bf16.msra.mxu0 %v1989_v5  ;;  %2008 = vmatpush3.bf16.msra.mxu1 %v1989_v5 }
 0x133   :  { %2010 = vmatprep.subr.msk.bf16.mxu0 %vm2508_vm4, %v2350_v11  ;;  %2014 = vmatprep.subr.msk.bf16.mxu1 %vm2535_vm11, %v2350_v11 }
 0x135   :  { %1868 = vmatmul.mubr.msk.f32.vlgmr.msra.gmra.mrb[8].mxu0 %vm508_vm5, %v2650_v6  ;;  %1890 = vmatmul.mubr.msk.f32.vlgmr.msra.gmra.mrb[8].mxu1 %vm508_vm5, %v2653_v16 }
 0x136   :  { %1870 = vmatprep.mubr.msk.f32.mxu0 %vm508_vm5, %v1682_v17  ;;  %1892 = vmatprep.mubr.msk.f32.mxu1 %vm508_vm5, %v1686_v18 }
 0x137   :  { %2012 = vmatpush3.bf16.msk.msra.mxu0 %vm2508_vm4, %v2350_v11  ;;  %2016 = vmatpush3.bf16.msk.msra.mxu1 %vm2535_vm11, %v2350_v11  ;;  %v180_v11 = vsel %vm138_vm0, %v2620_v10, 0.0  ;;  %vm707_vm4 = vcmask 130048  }
 0x138   :  { %v181_v15 = vadd.f32 %v180_v11, %v179_v27 }
 0x139   :  { %1871 = vmatmul.mubr.msk.f32.gmra.mrb[10].mxu0 %vm508_vm5, %v1683_v2  ;;  %1893 = vmatmul.mubr.msk.f32.gmra.mrb[10].mxu1 %vm508_vm5, %v1687_v19 }
 0x13a   :  { %v183_v29 = vadd.f32 %v182_v28, %v181_v15 }
 0x13c   :  { %v185_v40 = vadd.f32 %v184_v36, %v183_v29 }
 0x13e   :  { %186 = vadd.xlane.f32.xlu0 %v185_v40 }
 0x15b   :  { %s2040_s2 = spop %2039 }
 0x15c   :  { %v196_v36 = vstv %s2040_s2  ;;  %s2356_s2 = smov [#allocation12]  }
 0x15d   :  { %2081 = vrcp.f32 %v196_v36  ;;  %v2353_v36 = vmov 0.0|0.0  }
 0x167   :  { %v2082_v9 = vpop.eup %2081 }
 0x1cb   :  { %v187_v29 = vpop.xlane.xlu0 %186 }
 0x1cc   :  { %v188_v40 = vrot.slane %v187_v29, 4 }
 0x1ce   :  { %v189_v30 = vadd.f32 %v188_v40, %v187_v29 }
 0x1d0   :  { %v190_v43 = vrot.slane %v189_v30, 2 }
 0x1d2   :  { %v191_v31 = vadd.f32 %v190_v43, %v189_v30 }
 0x1d4   :  { %v192_v32 = vrot.slane %v191_v31, 1 }
 0x1d6   :  { %v193_v33 = vadd.f32 %v192_v32, %v191_v31 }
 0x1d8   :  { %2041 = vpush %v193_v33 }
 0x1d9   :  { %2043 = vpush %v2082_v9 }
 0x208   :  { %v1869_v35 = vpop.f32.mrb[8].mxu0  ;;  %v1891_v10 = vpop.f32.mrb[8].mxu1 }
 0x209   :  { %v704_v38 = vmax.f32 %v1869_v35, %v1891_v10  ;;  %v587_v22 = vpop.f32.mrb[9].mxu0  ;;  %v684_v39 = vpop.f32.mrb[9].mxu1  ;;  %s2726_s25 = spop %2041 }
 0x20a   :  { %v703_v42 = vmax.f32 %v587_v22, %v684_v39  ;;  %s2728_s26 = spop %2043  ;;  %s195_s28 = smul.f32 0.05, %s2726_s25 }
 0x20b   :  { %709 = vst.msk [vmem:[#allocation8 + $0x8] sm:$0xff] %vm707_vm4, %v704_v38  ;;  %vm717_vm11 = vcmp.gt.f32.partialorder %v704_v38, 0.0  ;;  %v729_v23 = vsub.f32 %v713_v37, %v704_v38  ;;  %s2155_s25 = scalar_lea.vmem %s1537_s24, 256 }
 0x20c   :  { %v1872_v44 = vpop.f32.mrb[10].mxu0  ;;  %v1894_v45 = vpop.f32.mrb[10].mxu1  ;;  %1899 = vmatprep.mubr.msk.f32.mxu0 %vm707_vm4, %v703_v42  ;;  %708 = vst.msk [vmem:[#allocation8] sm:$0xff] %vm707_vm4, %v703_v42  ;;  %1909 = vmatprep.mubr.msk.f32.mxu1 %vm707_vm4, %v703_v42  ;;  %vm716_vm5 = vcmp.gt.f32.partialorder %v703_v42, 0.0  ;;  %v1697_v48 = vsel %vm717_vm11, 1.0, %v2351_v21  ;;  %v728_v49 = vsub.f32 %v712_v41, %v703_v42  ;;  %s2736_s22 = smul.f32 %s2728_s26, %s195_s28  ;;  %p2156_p10 = scmp.ne.s32.totalorder %s1537_s24, %s2155_s25 }
 0x20d   :  { %v706_v50 = vmax.f32 %v1872_v44, %v1894_v45  ;;  %v597_v51 = vpop.f32.mrb[11].mxu0  ;;  %v694_v52 = vpop.f32.mrb[11].mxu1  ;;  %1900 = vmatmul.mubr.msk.f32.vlgmr.msra.gmra.mrb[12].mxu0 %vm707_vm4, %v704_v38  ;;  %1910 = vmatmul.mubr.msk.f32.vlgmr.msra.gmra.mrb[12].mxu1 %vm707_vm4, %v704_v38  ;;  %v1696_v55 = vsel %vm716_vm5, 1.0, %v2351_v21  ;;  %v733_v56 = vand.u32 2147483647, %v729_v23  ;;  %v745_v57 = vsel %vm707_vm4, %v1697_v48, 0.0  ;;  %p2161_p12 = scmp.lt.s32.totalorder %s2155_s25, %s2155_s25 }
 0x20e   :  { %v705_v58 = vmax.f32 %v597_v51, %v694_v52  ;;  %v732_v59 = vand.u32 2147483647, %v728_v49  ;;  %v744_v60 = vsel %vm707_vm4, %v1696_v55, 0.0 }
 0x20f   :  { %711 = vst.msk [vmem:[#allocation8 + $0x18] sm:$0xff] %vm707_vm4, %v706_v50  ;;  %vm719_vm8 = vcmp.gt.f32.partialorder %v706_v50, 0.0  ;;  %v731_v61 = vsub.f32 %v715_v47, %v706_v50  ;;  %v737_v62 = vmul.f32 %v1697_v48, %v733_v56  ;;  %v746_v63 = vadd.f32 %v745_v57, %v744_v60  ;;  %p2162_p13 = por %p2161_p12, %p2160_p11 }
 0x210   :  { %710 = vst.msk [vmem:[#allocation8 + $0x10] sm:$0xff] %vm707_vm4, %v705_v58  ;;  %1902 = vmatprep.mubr.msk.f32.mxu0 %vm707_vm4, %v705_v58  ;;  %1912 = vmatprep.mubr.msk.f32.mxu1 %vm707_vm4, %v705_v58  ;;  %vm718_vm9 = vcmp.gt.f32.partialorder %v705_v58, 0.0  ;;  %v730_v0 = vsub.f32 %v714_v46, %v705_v58  ;;  %v736_v12 = vmul.f32 %v1696_v55, %v732_v59  ;;  %v1699_v3 = vsel %vm719_vm8, 1.0, %v2351_v21 }
 0x211   :  { %1903 = vmatmul.mubr.msk.f32.gmra.mrb[14].mxu0 %vm707_vm4, %v706_v50  ;;  %1913 = vmatmul.mubr.msk.f32.gmra.mrb[14].mxu1 %vm707_vm4, %v706_v50  ;;  %v1698_v13 = vsel %vm718_vm9, 1.0, %v2351_v21  ;;  %v735_v5 = vand.u32 2147483647, %v731_v61  ;;  %741 = vst.msk [vmem:[#allocation14 + $0x8] sm:$0xff] %vm707_vm4, %v737_v62  ;;  %v761_v14 = vsel %vm707_vm4, %v737_v62, 0.0  ;;  %v749_v25 = vsel %vm707_vm4, %v1699_v3, 0.0  ;;  %p2163_p0 = pnand %p2162_p13, %p2156_p10 }
 0x212   :  { %v734_v17 = vand.u32 2147483647, %v730_v0  ;;  %740 = vst.msk [vmem:[#allocation14] sm:$0xff] %vm707_vm4, %v736_v12  ;;  %v747_v18 = vsel %vm707_vm4, %v1698_v13, 0.0  ;;  %v760_v2 = vsel %vm707_vm4, %v736_v12, 0.0  ;;  %1923 = vmatprep.mubr.msk.f32.mxu0 %vm138_vm0, %v2606_v53  ;;  %1934 = vmatprep.mubr.msk.f32.mxu1 %vm138_vm0, %v2609_v54 }
 0x213   :  { %v739_v19 = vmul.f32 %v1699_v3, %v735_v5  ;;  %v748_v20 = vadd.f32 %v747_v18, %v746_v63  ;;  %v762_v24 = vadd.f32 %v761_v14, %v760_v2  ;;  %v1132_v3 = vld [vmem:[%s2922_s3 + $0x8] sm:$0xff]  ;;  %v1131_v18 = vld [vmem:[%s2922_s3] sm:$0xff] }
 0x214   :  { %v738_v26 = vmul.f32 %v1698_v13, %v734_v17  ;;  %v2352_v13 = vmov 1.0  }
 0x215   :  { %743 = vst.msk [vmem:[#allocation14 + $0x18] sm:$0xff] %vm707_vm4, %v739_v19  ;;  %v750_v8 = vadd.f32 %v749_v25, %v748_v20  ;;  %v765_v15 = vsel %vm707_vm4, %v739_v19, 0.0 }
 0x216   :  { %742 = vst.msk [vmem:[#allocation14 + $0x10] sm:$0xff] %vm707_vm4, %v738_v26  ;;  %v763_v27 = vsel %vm707_vm4, %v738_v26, 0.0 }
 0x217   :  { %751 = vadd.xlane.f32.xlu1 %v750_v8  ;;  %v764_v11 = vadd.f32 %v763_v27, %v762_v24 }
 0x219   :  { %v766_v28 = vadd.f32 %v765_v15, %v764_v11 }
 0x21b   :  { %767 = vadd.xlane.f32.xlu1 %v766_v28 }
 0x2a4   :  { %v752_v34 = vpop.xlane.xlu1 %751 }
 0x2a5   :  { %v753_v35 = vrot.slane %v752_v34, 4 }
 0x2a7   :  { %v754_v10 = vadd.f32 %v753_v35, %v752_v34 }
 0x2a8   :  { %v768_v37 = vpop.xlane.xlu1 %767 }
 0x2a9   :  { %v755_v38 = vrot.slane %v754_v10, 2  ;;  %v769_v22 = vrot.slane %v768_v37, 4 }
 0x2ab   :  { %v770_v39 = vadd.f32 %v769_v22, %v768_v37  ;;  %v756_v41 = vadd.f32 %v755_v38, %v754_v10 }
 0x2ad   :  { %v771_v42 = vrot.slane %v770_v39, 2  ;;  %v757_v23 = vrot.slane %v756_v41, 1 }
 0x2af   :  { %v758_v44 = vadd.f32 %v757_v23, %v756_v41  ;;  %v772_v45 = vadd.f32 %v771_v42, %v770_v39 }
 0x2b1   :  { %2045 = vpush %v758_v44  ;;  %v773_v46 = vrot.slane %v772_v45, 1 }
 0x2b3   :  { %v774_v47 = vadd.f32 %v773_v46, %v772_v45 }
 0x2b5   :  { %2047 = vpush %v774_v47 }
 0x2e0   :  { %v1901_v48 = vpop.f32.mrb[12].mxu0  ;;  %v1911_v49 = vpop.f32.mrb[12].mxu1 }
 0x2e1   :  { %v965_v50 = vmax.f32 %v1901_v48, %v1911_v49  ;;  %v860_v51 = vpop.f32.mrb[13].mxu0  ;;  %v945_v52 = vpop.f32.mrb[13].mxu1 }
 0x2e2   :  { %v964_v55 = vmax.f32 %v860_v51, %v945_v52  ;;  %s2046_s27 = spop %2045  ;;  %v1482_v52 = vld [vmem:[%s2923_s4] sm:$0xff]  ;;  %s1558_s4 = sshll.u32 %s2356_s2, 4  ;;  %s2784_s4 = int_to_ptr.vmem [resolvable:$true] %s1558_s4 }
 0x2e3   :  { %v777_v56 = vstv %s2046_s27 }
 0x2e4   :  { %v2017_v57 = vpack.c.bf16 %v965_v50, %v964_v55  ;;  %2083 = vrcp.f32 %v777_v56  ;;  %v1904_v58 = vpop.f32.mrb[14].mxu0  ;;  %v1914_v59 = vpop.f32.mrb[14].mxu1 }
 0x2e5   :  { %v967_v60 = vmax.f32 %v1904_v58, %v1914_v59  ;;  %v870_v61 = vpop.f32.mrb[15].mxu0  ;;  %v955_v62 = vpop.f32.mrb[15].mxu1 }
 0x2e6   :  { %v966_v63 = vmax.f32 %v870_v61, %v955_v62  ;;  %2018 = vmatprep.subr.bf16.mxu0 %v2017_v57  ;;  %2026 = vmatprep.subr.bf16.mxu1 %v2017_v57  ;;  %s2048_s1 = spop %2047 }
 0x2e7   :  { %2020 = vmatpush3.bf16.msra.mxu0 %v2017_v57  ;;  %2028 = vmatpush3.bf16.msra.mxu1 %v2017_v57  ;;  %s776_s29 = smul.f32 0.025, %s2048_s1 }
 0x2e8   :  { %v2021_v0 = vpack.c.bf16 %v967_v60, %v966_v63 }
 0x2ea   :  { %2022 = vmatprep.subr.bf16.mxu0 %v2021_v0  ;;  %2030 = vmatprep.subr.bf16.mxu1 %v2021_v0 }
 0x2eb   :  { %2024 = vmatpush3.bf16.msra.mxu0 %v2021_v0  ;;  %2032 = vmatpush3.bf16.msra.mxu1 %v2021_v0 }
 0x2ec   :  { %1937 = vmatprep.subr.msk.mxu0 %vm209_vm1, %v2352_v13  ;;  %1942 = vmatprep.subr.msk.mxu1 %vm222_vm6, %v2352_v13 }
 0x2ee   :  { %v2084_v12 = vpop.eup %2083  ;;  %1924 = vmatmul.mubr.msk.f32.vlgmr.msra.gmra.mrb[16].mxu0 %vm138_vm0, %v2650_v6  ;;  %1935 = vmatmul.mubr.msk.f32.vlgmr.msra.gmra.mrb[16].mxu1 %vm138_vm0, %v2653_v16  ;;  %vm1128_vm0 = vcmask 64512  }
 0x2ef   :  { %2049 = vpush %v2084_v12  ;;  %1938 = vmatpush3.msk.msra.mxu0 %vm209_vm1, %v2352_v13  ;;  %1943 = vmatpush3.msk.msra.mxu1 %vm222_vm6, %v2352_v13 }
 0x2f0   :  { %2033 = vmatprep.subr.bf16.mxu0 %v2353_v36  ;;  %2036 = vmatprep.subr.bf16.mxu1 %v2353_v36 }
 0x320   :  { %s2050_s30 = spop %2049 }
 0x321   :  { %s2738_s13 = smul.f32 %s2050_s30, %s776_s29 }
 0x323   :  { %s781_s14 = sadd.f32 %s2738_s13, %s2736_s22 }
 0x3c1   :  { %v1925_v6 = vpop.f32.mrb[16].mxu0  ;;  %v1936_v16 = vpop.f32.mrb[16].mxu1 }
 0x3c2   :  { %v1127_v5 = vmax.f32 %v1925_v6, %v1936_v16  ;;  %v1038_v14 = vpop.f32.mrb[17].mxu0  ;;  %v1117_v17 = vpop.f32.mrb[17].mxu1 }
 0x3c3   :  { %v1126_v4 = vmax.f32 %v1038_v14, %v1117_v17 }
 0x3c4   :  { %1130 = vst.msk [vmem:[#allocation9 + $0x8] sm:$0xff] %vm1128_vm0, %v1127_v5  ;;  %vm1134_vm1 = vcmp.gt.f32.partialorder %v1127_v5, 0.0  ;;  %v1140_v1 = vsub.f32 %v1132_v3, %v1127_v5 }
 0x3c5   :  { %1939 = vmatprep.mubr.msk.f32.mxu0 %vm1128_vm0, %v1126_v4  ;;  %1129 = vst.msk [vmem:[#allocation9] sm:$0xff] %vm1128_vm0, %v1126_v4  ;;  %1944 = vmatprep.mubr.msk.f32.mxu1 %vm1128_vm0, %v1126_v4  ;;  %vm1133_vm6 = vcmp.gt.f32.partialorder %v1126_v4, 0.0  ;;  %v1717_v7 = vsel %vm1134_vm1, 1.0, %v2351_v21  ;;  %v1139_v2 = vsub.f32 %v1131_v18, %v1126_v4 }
 0x3c6   :  { %1940 = vmatmul.mubr.msk.f32.vlgmr.msra.gmra.mrb[18].mxu0 %vm1128_vm0, %v1127_v5  ;;  %1945 = vmatmul.mubr.msk.f32.vlgmr.msra.gmra.mrb[18].mxu1 %vm1128_vm0, %v1127_v5  ;;  %v1716_v19 = vsel %vm1133_vm6, 1.0, %v2351_v21  ;;  %v1148_v20 = vsel %vm1128_vm0, %v1717_v7, 0.0  ;;  %v1142_v24 = vand.u32 2147483647, %v1140_v1 }
 0x3c7   :  { %v1147_v25 = vsel %vm1128_vm0, %v1716_v19, 0.0  ;;  %v1141_v26 = vand.u32 2147483647, %v1139_v2  ;;  %1951 = vmatprep.mubr.msk.f32.mxu0 %vm2354_vm10, %v2351_v21  ;;  %1958 = vmatprep.mubr.msk.f32.mxu1 %vm2354_vm10, %v2351_v21 }
 0x3c8   :  { %v1149_v8 = vadd.f32 %v1148_v20, %v1147_v25  ;;  %v1144_v27 = vmul.f32 %v1717_v7, %v1142_v24 }
 0x3c9   :  { %v1143_v11 = vmul.f32 %v1716_v19, %v1141_v26 }
 0x3ca   :  { %1150 = vadd.xlane.f32.xlu0 %v1149_v8  ;;  %v1160_v15 = vsel %vm1128_vm0, %v1144_v27, 0.0  ;;  %1146 = vst.msk [vmem:[#allocation15 + $0x8] sm:$0xff] %vm1128_vm0, %v1144_v27 }
 0x3cb   :  { %v1159_v28 = vsel %vm1128_vm0, %v1143_v11, 0.0  ;;  %1145 = vst.msk [vmem:[#allocation15] sm:$0xff] %vm1128_vm0, %v1143_v11 }
 0x3cc   :  { %v1161_v29 = vadd.f32 %v1160_v15, %v1159_v28 }
 0x3ce   :  { %1162 = vadd.xlane.f32.xlu1 %v1161_v29 }
 0x457   :  { %v1151_v40 = vpop.xlane.xlu0 %1150 }
 0x458   :  { %v1152_v30 = vrot.slane %v1151_v40, 4 }
 0x45a   :  { %v1153_v43 = vadd.f32 %v1152_v30, %v1151_v40 }
 0x45b   :  { %v1163_v31 = vpop.xlane.xlu1 %1162 }
 0x45c   :  { %v1154_v32 = vrot.slane %v1153_v43, 2  ;;  %v1164_v33 = vrot.slane %v1163_v31, 4 }
 0x45e   :  { %v1165_v9 = vadd.f32 %v1164_v33, %v1163_v31  ;;  %v1155_v34 = vadd.f32 %v1154_v32, %v1153_v43 }
 0x460   :  { %v1166_v35 = vrot.slane %v1165_v9, 2  ;;  %v1156_v10 = vrot.slane %v1155_v34, 1 }
 0x462   :  { %v1157_v37 = vadd.f32 %v1156_v10, %v1155_v34  ;;  %v1167_v38 = vadd.f32 %v1166_v35, %v1165_v9 }
 0x464   :  { %2051 = vpush %v1157_v37  ;;  %v1168_v22 = vrot.slane %v1167_v38, 1 }
 0x466   :  { %v1169_v39 = vadd.f32 %v1168_v22, %v1167_v38 }
 0x468   :  { %2053 = vpush %v1169_v39 }
 0x495   :  { %s2052_s3 = spop %2051 }
 0x496   :  { %v1172_v41 = vstv %s2052_s3 }
 0x497   :  { %2085 = vrcp.f32 %v1172_v41 }
 0x499   :  { %v1941_v42 = vpop.f32.mrb[18].mxu0  ;;  %v1946_v23 = vpop.f32.mrb[18].mxu1 }
 0x49a   :  { %v1334_v44 = vmax.f32 %v1941_v42, %v1946_v23  ;;  %v1249_v45 = vpop.f32.mrb[19].mxu0  ;;  %v1324_v46 = vpop.f32.mrb[19].mxu1 }
 0x49b   :  { %v1333_v47 = vmax.f32 %v1249_v45, %v1324_v46 }
 0x49d   :  { %v2034_v48 = vpack.c.bf16 %v1334_v44, %v1333_v47 }
 0x49f   :  { %2035 = vmatpush3.bf16.msra.mxu0 %v2034_v48  ;;  %2038 = vmatpush3.bf16.msra.mxu1 %v2034_v48 }
 0x4a1   :  { %v2086_v49 = vpop.eup %2085 }
 0x4a2   :  { %2055 = vpush %v2086_v49  ;;  %1952 = vmatmul.mubr.msk.f32.vlgmr.msra.gmra.mrb[20].mxu0 %vm707_vm4, %v2606_v53  ;;  %1959 = vmatmul.mubr.msk.f32.vlgmr.msra.gmra.mrb[20].mxu1 %vm707_vm4, %v2609_v54 }
 0x575   :  { %v1403_v50 = vpop.f32.mrb[20].mxu0  ;;  %v1475_v51 = vpop.f32.mrb[20].mxu1 }
 0x576   :  { %v1479_v55 = vmax.f32 %v1403_v50, %v1475_v51  ;;  %v1953_v56 = vpop.f32.mrb[21].mxu0  ;;  %v1960_v57 = vpop.f32.mrb[21].mxu1 }
 0x578   :  { %vm1483_vm13 = vcmp.gt.f32.partialorder %v1479_v55, 0.0  ;;  %1481 = vst.msk [vmem:[#allocation11] sm:$0xff] %vm1480_vm12, %v1479_v55  ;;  %v1486_v58 = vsub.f32 %v1482_v52, %v1479_v55 }
 0x579   :  { %v1726_v59 = vsel %vm1483_vm13, 1.0, %v2351_v21 }
 0x57a   :  { %v1490_v60 = vsel %vm1480_vm12, %v1726_v59, 0.0  ;;  %v1487_v53 = vand.u32 2147483647, %v1486_v58 }
 0x57b   :  { %1491 = vadd.xlane.f32.xlu0 %v1490_v60 }
 0x57c   :  { %v1488_v61 = vmul.f32 %v1726_v59, %v1487_v53 }
 0x57e   :  { %v1500_v54 = vsel %vm1480_vm12, %v1488_v61, 0.0  ;;  %1489 = vst.msk [vmem:[#allocation17] sm:$0xff] %vm1480_vm12, %v1488_v61 }
 0x57f   :  { %1501 = vadd.xlane.f32.xlu1 %v1500_v54 }
 0x608   :  { %v1492_v62 = vpop.xlane.xlu0 %1491 }
 0x609   :  { %v1493_v63 = vrot.slane %v1492_v62, 4 }
 0x60a   :  { %2166 = shalt.err (!%p2163_p0)
}
 0x60b   :  { %s2167_s28 = scalar_lea.hbm %s2925_s6, 256 }
 0x60c   :  { %p2168_p1 = scmp.ne.s32.totalorder %s2925_s6, %s2167_s28  ;;  %p2171_p2 = scmp.lt.u32.totalorder %s2167_s28, %s2925_s6 }
 0x60e   :  { %p2173_p3 = pnand %p2171_p2, %p2168_p1 }
 0x610   :  { %2176 = shalt.err (!%p2173_p3)
}
 0x611   :  { %1542 = dma.vmem_to_hbm [thread:$0]  %s1537_s24, 256, %s2925_s6, [#allocation10], %s2347_s15, %s2347_s15, %s2348_s16   ;;  %v1494_v21 = vadd.f32 %v1493_v63, %v1492_v62 }
 0x612   :  { %s2177_s20 = scalar_lea.vmem %s2784_s4, 1024  ;;  %p2182_p5 = scmp.lt.s32.totalorder %s2784_s4, %s2784_s4 }
 0x613   :  { %p2178_p4 = scmp.ne.s32.totalorder %s2784_s4, %s2177_s20  ;;  %p2183_p6 = scmp.lt.s32.totalorder %s2177_s20, %s2177_s20 }
 0x615   :  { %p2184_p7 = por %p2183_p6, %p2182_p5 }
 0x617   :  { %p2185_p8 = pnand %p2184_p7, %p2178_p4 }
 0x619   :  { %2188 = shalt.err (!%p2185_p8)
}
 0x61a   :  { %s2189_s23 = scalar_lea.hbm %s2927_s8, 1024 }
 0x61b   :  { %p2190_p9 = scmp.ne.s32.totalorder %s2927_s8, %s2189_s23  ;;  %p2193_p10 = scmp.lt.u32.totalorder %s2189_s23, %s2927_s8 }
 0x61d   :  { %p2195_p11 = pnand %p2193_p10, %p2190_p9 }
 0x61f   :  { %2198 = shalt.err (!%p2195_p11)
}
 0x620   :  { %1564 = dma.vmem_to_hbm [thread:$0]  %s2784_s4, 1024, %s2927_s8, [#allocation13], %s2347_s15, %s2347_s15, %s2348_s16   ;;  %v1502_v0 = vpop.xlane.xlu1 %1501  ;;  %v1495_v12 = vrot.slane %v1494_v21, 2 }
 0x621   :  { %v1503_v13 = vrot.slane %v1502_v0, 4  ;;  %s2357_s27 = smov [#allocation15]   ;;  %s2358_s1 = smov [#allocation8]  }
 0x622   :  { %s1582_s28 = sshll.u32 %s2357_s27, 4  ;;  %s1524_s29 = sshll.u32 %s2358_s1, 4  ;;  %v1496_v6 = vadd.f32 %v1495_v12, %v1494_v21  ;;  %s1583_s28 = int_to_ptr.vmem [resolvable:$true] %s1582_s28  ;;  %s2821_s29 = int_to_ptr.vmem [resolvable:$true] %s1524_s29 }
 0x623   :  { %v1504_v16 = vadd.f32 %v1503_v13, %v1502_v0  ;;  %s2199_s30 = scalar_lea.vmem %s1583_s28, 256  ;;  %p2204_p13 = scmp.lt.s32.totalorder %s1583_s28, %s1583_s28 }
 0x624   :  { %p2200_p12 = scmp.ne.s32.totalorder %s1583_s28, %s2199_s30  ;;  %p2205_p0 = scmp.lt.s32.totalorder %s2199_s30, %s2199_s30 }
 0x626   :  { %p2206_p1 = por %p2205_p0, %p2204_p13 }
 0x628   :  { %p2207_p2 = pnand %p2206_p1, %p2200_p12 }
 0x62a   :  { %2210 = shalt.err (!%p2207_p2)
}
 0x62b   :  { %s2211_s17 = scalar_lea.hbm %s2929_s10, 256 }
 0x62c   :  { %p2212_p3 = scmp.ne.s32.totalorder %s2929_s10, %s2211_s17  ;;  %p2215_p4 = scmp.lt.u32.totalorder %s2211_s17, %s2929_s10 }
 0x62e   :  { %p2217_p5 = pnand %p2215_p4, %p2212_p3 }
 0x630   :  { %2220 = shalt.err (!%p2217_p5)
}
 0x631   :  { %1588 = dma.vmem_to_hbm [thread:$0]  %s1583_s28, 256, %s2929_s10, [#allocation16], %s2347_s15, %s2347_s15, %s2348_s16  }
 0x632   :  { %s2221_s0 = scalar_lea.vmem %s2821_s29, 512  ;;  %p2226_p7 = scmp.lt.s32.totalorder %s2821_s29, %s2821_s29 }
 0x633   :  { %p2222_p6 = scmp.ne.s32.totalorder %s2821_s29, %s2221_s0  ;;  %p2227_p8 = scmp.lt.s32.totalorder %s2221_s0, %s2221_s0 }
 0x635   :  { %p2228_p9 = por %p2227_p8, %p2226_p7 }
 0x637   :  { %p2229_p10 = pnand %p2228_p9, %p2222_p6 }
 0x639   :  { %2232 = shalt.err (!%p2229_p10)
}
 0x63a   :  { %s2233_s26 = scalar_lea.hbm %s2924_s5, 512 }
 0x63b   :  { %p2234_p11 = scmp.ne.s32.totalorder %s2924_s5, %s2233_s26  ;;  %p2237_p12 = scmp.lt.u32.totalorder %s2233_s26, %s2924_s5 }
 0x63d   :  { %p2239_p13 = pnand %p2237_p12, %p2234_p11 }
 0x63f   :  { %2242 = shalt.err (!%p2239_p13)
}
 0x640   :  { %1530 = dma.vmem_to_hbm [thread:$0]  %s2821_s29, 512, %s2924_s5, [#allocation4], %s2347_s15, %s2347_s15, %s2348_s16   ;;  %v1505_v3 = vrot.slane %v1504_v16, 2  ;;  %v1497_v5 = vrot.slane %v1496_v6, 1 }
 0x641   :  { %s2359_s30 = smov [#allocation11]   ;;  %s2360_s4 = smov [#allocation14]  }
 0x642   :  { %s1549_s8 = sshll.u32 %s2359_s30, 4  ;;  %s1570_s17 = sshll.u32 %s2360_s4, 4  ;;  %v1506_v14 = vadd.f32 %v1505_v3, %v1504_v16  ;;  %v1498_v17 = vadd.f32 %v1497_v5, %v1496_v6  ;;  %s1550_s8 = int_to_ptr.vmem [resolvable:$true] %s1549_s8  ;;  %s2858_s17 = int_to_ptr.vmem [resolvable:$true] %s1570_s17 }
 0x643   :  { %s2243_s18 = scalar_lea.vmem %s1550_s8, 128  ;;  %p2248_p1 = scmp.lt.s32.totalorder %s1550_s8, %s1550_s8 }
 0x644   :  { %p2244_p0 = scmp.ne.s32.totalorder %s1550_s8, %s2243_s18  ;;  %p2249_p2 = scmp.lt.s32.totalorder %s2243_s18, %s2243_s18 }
 0x646   :  { %p2250_p3 = por %p2249_p2, %p2248_p1 }
 0x648   :  { %p2251_p4 = pnand %p2250_p3, %p2244_p0 }
 0x64a   :  { %2254 = shalt.err (!%p2251_p4)
}
 0x64b   :  { %s2255_s29 = scalar_lea.hbm %s2926_s7, 128 }
 0x64c   :  { %p2256_p5 = scmp.ne.s32.totalorder %s2926_s7, %s2255_s29  ;;  %p2259_p6 = scmp.lt.u32.totalorder %s2255_s29, %s2926_s7 }
 0x64e   :  { %p2261_p7 = pnand %p2259_p6, %p2256_p5 }
 0x650   :  { %2264 = shalt.err (!%p2261_p7)
}
 0x651   :  { %1552 = dma.vmem_to_hbm [thread:$0]  %s1550_s8, 128, %s2926_s7, [#allocation10]   ;;  %2057 = vpush %v1498_v17  ;;  %v1507_v18 = vrot.slane %v1506_v14, 1 }
 0x652   :  { %s2265_s25 = scalar_lea.vmem %s2858_s17, 512  ;;  %p2270_p9 = scmp.lt.s32.totalorder %s2858_s17, %s2858_s17 }
 0x653   :  { %p2266_p8 = scmp.ne.s32.totalorder %s2858_s17, %s2265_s25  ;;  %p2271_p10 = scmp.lt.s32.totalorder %s2265_s25, %s2265_s25 }
 0x655   :  { %p2272_p11 = por %p2271_p10, %p2270_p9 }
 0x657   :  { %p2273_p12 = pnand %p2272_p11, %p2266_p8 }
 0x659   :  { %2276 = shalt.err (!%p2273_p12)
}
 0x65a   :  { %s2277_s24 = scalar_lea.hbm %s2928_s9, 512 }
 0x65b   :  { %p2278_p13 = scmp.ne.s32.totalorder %s2928_s9, %s2277_s24  ;;  %p2281_p0 = scmp.lt.u32.totalorder %s2277_s24, %s2928_s9 }
 0x65d   :  { %p2283_p1 = pnand %p2281_p0, %p2278_p13 }
 0x65f   :  { %2286 = shalt.err (!%p2283_p1)
}
 0x660   :  { %1576 = dma.vmem_to_hbm [thread:$0]  %s2858_s17, 512, %s2928_s9, [#allocation13], %s2347_s15, %s2347_s15, %s2348_s16   ;;  %v1508_v4 = vadd.f32 %v1507_v18, %v1506_v14 }
 0x661   :  { %s2361_s8 = smov [#allocation17]  }
 0x662   :  { %s1595_s4 = sshll.u32 %s2361_s8, 4  ;;  %2059 = vpush %v1508_v4  ;;  %s1596_s4 = int_to_ptr.vmem [resolvable:$true] %s1595_s4 }
 0x663   :  { %s2287_s18 = scalar_lea.vmem %s1596_s4, 128  ;;  %p2292_p3 = scmp.lt.s32.totalorder %s1596_s4, %s1596_s4 }
 0x664   :  { %p2288_p2 = scmp.ne.s32.totalorder %s1596_s4, %s2287_s18  ;;  %p2293_p4 = scmp.lt.s32.totalorder %s2287_s18, %s2287_s18 }
 0x666   :  { %p2294_p5 = por %p2293_p4, %p2292_p3 }
 0x668   :  { %p2295_p6 = pnand %p2294_p5, %p2288_p2 }
 0x66a   :  { %2298 = shalt.err (!%p2295_p6)
}
 0x66b   :  { %s2299_s29 = scalar_lea.hbm %s2930_s11, 128 }
 0x66c   :  { %p2300_p7 = scmp.ne.s32.totalorder %s2930_s11, %s2299_s29  ;;  %p2303_p8 = scmp.lt.u32.totalorder %s2299_s29, %s2930_s11 }
 0x66e   :  { %p2305_p9 = pnand %p2303_p8, %p2300_p7 }
 0x670   :  { %2308 = shalt.err (!%p2305_p9)
}
 0x671   :  { %1598 = dma.vmem_to_hbm [thread:$0]  %s1596_s4, 128, %s2930_s11, [#allocation16]   ;;  %vm1517_vm14 = vcmask 0  }
 0x672   :  { %s2054_s21 = spop %2053  ;;  %s2362_s10 = smov [#allocation18]  }
 0x673   :  { %s2056_s23 = spop %2055  ;;  %s1171_s2 = smul.f32 0.0125, %s2054_s21 }
 0x674   :  { %s1605_s7 = sshll.u32 %s2362_s10, 4  ;;  %s1606_s7 = int_to_ptr.vmem [resolvable:$true] %s1605_s7 }
 0x675   :  { %s1175_s25 = smul.f32 %s2056_s23, %s1171_s2  ;;  %s2309_s11 = scalar_lea.vmem %s1606_s7, 16 }
 0x676   :  { %p2310_p10 = scmp.ne.s32.totalorder %s1606_s7, %s2309_s11  ;;  %s2313_s30 = scalar_lea.vmem %s1606_s7, 32 }
 0x677   :  { %s1176_s24 = sadd.f32 %s1175_s25, %s781_s14  ;;  %p2314_p11 = scmp.lt.s32.totalorder %s1606_s7, %s1606_s7 }
 0x678   :  { %p2315_p12 = scmp.lt.s32.totalorder %s2313_s30, %s2309_s11 }
 0x67a   :  { %p2316_p13 = por %p2315_p12, %p2314_p11 }
 0x67c   :  { %p2317_p0 = pnand %p2316_p13, %p2310_p10 }
 0x682   :  { %s2058_s0 = spop %2057 }
 0x683   :  { %v1511_v1 = vstv %s2058_s0 }
 0x684   :  { %2087 = vrcp.f32 %v1511_v1 }
 0x68e   :  { %v2088_v7 = vpop.eup %2087 }
 0x68f   :  { %2061 = vpush %v2088_v7 }
 0x693   :  { %s2060_s26 = spop %2059 }
 0x694   :  { %s1510_s6 = smul.f32 0.00625, %s2060_s26 }
 0x6c0   :  { %s2062_s27 = spop %2061 }
 0x6c1   :  { %s1514_s1 = smul.f32 %s2062_s27, %s1510_s6 }
 0x6c3   :  { %s1515_s28 = sadd.f32 %s1514_s1, %s1176_s24 }
 0x6c5   :  { %v1516_v2 = vstv %s1515_s28 }
 0x6c6   :  { %1518 = vst.msk [vmem:[#allocation18] sm:$0x1] %vm1517_vm14, %v1516_v2 }
 0x6c7   :  { %2320 = shalt.err (!%p2317_p0)
}
 0x6c8   :  { %s2321_s13 = scalar_lea.hbm %s2931_s12, 16 }
 0x6c9   :  { %p2322_p1 = scmp.ne.s32.totalorder %s2931_s12, %s2321_s13  ;;  %p2325_p2 = scmp.lt.u32.totalorder %s2321_s13, %s2931_s12 }
 0x6cb   :  { %p2327_p3 = pnand %p2325_p2, %p2322_p1 }
 0x6cd   :  { %2330 = shalt.err (!%p2327_p3)
}
 0x6ce   :  { %1608 = dma.vmem_to_hbm [thread:$0]  %s1606_s7, 16, %s2931_s12, [#allocation19]  }
 0x6cf   :  { %2335 = dma.done.wait [#allocation4], 512  }
 0x6d0   :  { %2336 = vsyncadd [#allocation4], 4294966784 }
 0x6d1   :  { %2337 = dma.done.wait [#allocation10], 384  }
 0x6d2   :  { %2338 = vsyncadd [#allocation10], 4294966912 }
 0x6d3   :  { %2339 = dma.done.wait [#allocation13], 1536  }
 0x6d4   :  { %2340 = vsyncadd [#allocation13], 4294965760 }
 0x6d5   :  { %2341 = dma.done.wait [#allocation16], 384  }
 0x6d6   :  { %2342 = vsyncadd [#allocation16], 4294966912 }
 0x6d7   :  { %2343 = dma.done.wait [#allocation19], 16  }
 0x6d8   :  { %2344 = vsyncadd [#allocation19], 4294967280 }
 0x6d9   :  { %1633 = vsyncpa [#allocation3], 1 }
 0x6da   :  { %1634 = vsyncpa [#allocation6], 1 }
 0x6db   :  { %1635 = vsyncpa [#allocation4], 1 }
 0x6dc   :  { %1636 = vsyncpa [#allocation10], 1 }
 0x6dd   :  { %1637 = vsyncpa [#allocation13], 1 }
 0x6de   :  { %1638 = vsyncpa [#allocation16], 1 }
 0x6df   :  { %1639 = vsyncpa [#allocation19], 1 }

</bundles_post_ra>
